<compile_context>
chip_gen: v7x
topology: tpu7x:2x2x1
jax: 0.10.0
libtpu: 0.0.40
codegen_flags: <defaults>
</compile_context>

<pallas_src>
import functools
import math

import jax
import jax.numpy as jnp
from jax.experimental import pallas as pl
from jax.experimental.pallas import tpu as pltpu


_VMEM_LIMIT = 48 * 1024 * 1024   # above all scoped defaults, below v7x physical (64 MiB)


# ----------------------------- tiling helpers -----------------------------

def _pick_tile(dim, candidates=(512, 256, 128)):
    """Largest candidate tile dividing `dim`; fall back to the full dim."""
    for c in candidates:
        if dim % c == 0:
            return c
    return dim


def _tile_pad(dim, candidates=(512, 256, 128)):
    """Return (tile, padded_dim).  Small indivisible dims use a full-dim block;
    large indivisible dims are padded to a 128 multiple (lane-dense, no huge tiles)."""
    for c in candidates:
        if dim % c == 0:
            return c, dim
    if dim <= max(candidates):
        return dim, dim
    padded = ((dim + 127) // 128) * 128
    for c in candidates:
        if padded % c == 0:
            return c, padded
    return 128, padded


# ----------------------------- tiled linear (+bias), bf16 MXU / f32 acc -----------------------------

def _linear_kernel(x_ref, w_ref, b_ref, o_ref, acc_ref):
    k = pl.program_id(2)

    @pl.when(k == 0)
    def _():
        acc_ref[...] = jnp.zeros_like(acc_ref)

    acc_ref[...] += jnp.dot(x_ref[...].astype(jnp.bfloat16),
                            w_ref[...].astype(jnp.bfloat16),
                            preferred_element_type=jnp.float32)

    @pl.when(k == pl.num_programs(2) - 1)
    def _():
        o_ref[...] = (acc_ref[...] + b_ref[...]).astype(o_ref.dtype)


def linear(x2d, w, b, out_dtype=jnp.float32):
    M, K = x2d.shape
    Kw, N = w.shape
    assert Kw == K
    tm, Mp = _tile_pad(M, (1024, 512, 256, 128))
    tk, Kp = _tile_pad(K, (512, 256, 128))
    tn, Np = _tile_pad(N, (512, 256, 128))
    if Mp != M or Kp != K:
        x2d = jnp.pad(x2d, ((0, Mp - M), (0, Kp - K)))
    if Kp != K or Np != N:
        w = jnp.pad(w, ((0, Kp - K), (0, Np - N)))
    if Np != N:
        b = jnp.pad(b, (0, Np - N))
    out = pl.pallas_call(
        _linear_kernel,
        out_shape=jax.ShapeDtypeStruct((Mp, Np), out_dtype),
        grid=(Mp // tm, Np // tn, Kp // tk),
        in_specs=[pl.BlockSpec((tm, tk), lambda i, j, k: (i, k)),
                  pl.BlockSpec((tk, tn), lambda i, j, k: (k, j)),
                  pl.BlockSpec((1, tn), lambda i, j, k: (0, j))],
        out_specs=pl.BlockSpec((tm, tn), lambda i, j, k: (i, j)),
        scratch_shapes=[pltpu.VMEM((tm, tn), jnp.float32)],
        compiler_params=pltpu.CompilerParams(
            dimension_semantics=("parallel", "parallel", "arbitrary"),
            vmem_limit_bytes=_VMEM_LIMIT),
    )(x2d, w, b.reshape(1, Np))
    if Mp != M or Np != N:
        out = out[:M, :N]
    return out


# ----------------------------- fused FFN: x@W1 + b1 -> GELU -> @W2 + b2 -----------------------------

def _ffn_kernel(x_ref, w1_ref, b1_ref, w2_ref, b2_ref, o_ref, acc_ref):
    j = pl.program_id(1)

    @pl.when(j == 0)
    def _():
        acc_ref[...] = jnp.zeros_like(acc_ref)

    hid = jnp.dot(x_ref[...].astype(jnp.bfloat16), w1_ref[...].astype(jnp.bfloat16),
                  preferred_element_type=jnp.float32) + b1_ref[...]
    # tanh-approx GELU (EUP slot instead of an erf polynomial's VALU ops)
    c = jnp.float32(math.sqrt(2.0 / math.pi))
    hid = 0.5 * hid * (1.0 + jnp.tanh(c * (hid + 0.044715 * hid * hid * hid)))
    acc_ref[...] += jnp.dot(hid.astype(jnp.bfloat16), w2_ref[...].astype(jnp.bfloat16),
                            preferred_element_type=jnp.float32)

    @pl.when(j == pl.num_programs(1) - 1)
    def _():
        o_ref[...] = acc_ref[...] + b2_ref[...]


def ffn(x2d, w1, b1, w2, b2):
    M, D = x2d.shape
    H = w1.shape[1]
    tm, Mp = _tile_pad(M, (256, 128))
    th, Hp = _tile_pad(H, (512, 256, 128))
    if Mp != M:
        x2d = jnp.pad(x2d, ((0, Mp - M), (0, 0)))
    if Hp != H:
        w1 = jnp.pad(w1, ((0, 0), (0, Hp - H)))
        b1 = jnp.pad(b1, (0, Hp - H))
        w2 = jnp.pad(w2, ((0, Hp - H), (0, 0)))
    out = pl.pallas_call(
        _ffn_kernel,
        out_shape=jax.ShapeDtypeStruct((Mp, D), jnp.float32),
        grid=(Mp // tm, Hp // th),
        in_specs=[pl.BlockSpec((tm, D), lambda i, j: (i, 0)),
                  pl.BlockSpec((D, th), lambda i, j: (0, j)),
                  pl.BlockSpec((1, th), lambda i, j: (0, j)),
                  pl.BlockSpec((th, D), lambda i, j: (j, 0)),
                  pl.BlockSpec((1, D), lambda i, j: (0, 0))],
        out_specs=pl.BlockSpec((tm, D), lambda i, j: (i, 0)),
        scratch_shapes=[pltpu.VMEM((tm, D), jnp.float32)],
        compiler_params=pltpu.CompilerParams(
            dimension_semantics=("parallel", "arbitrary"),
            vmem_limit_bytes=_VMEM_LIMIT),
    )(x2d, w1, b1.reshape(1, Hp), w2, b2.reshape(1, D))
    return out[:M] if Mp != M else out


# ----------------------------- LayerNorm (residual add fused in) -----------------------------

def _ln_math(x, g, b):
    mean = jnp.mean(x, axis=-1, keepdims=True)
    xc = x - mean
    var = jnp.mean(xc * xc, axis=-1, keepdims=True)
    return xc * jax.lax.rsqrt(var + 1e-5) * g + b


def _add_layernorm_kernel(x_ref, r_ref, g_ref, b_ref, o_ref):
    o_ref[...] = _ln_math(x_ref[...] + r_ref[...], g_ref[...], b_ref[...])


def _layernorm_kernel(x_ref, g_ref, b_ref, o_ref):
    o_ref[...] = _ln_math(x_ref[...], g_ref[...], b_ref[...])


def _ln_call(kernel, row_args, g, b, M, D):
    tm = _pick_tile(M, (1024, 512, 256, 128))
    row_spec = pl.BlockSpec((tm, D), lambda i: (i, 0))
    vec_spec = pl.BlockSpec((1, D), lambda i: (0, 0))
    return pl.pallas_call(
        kernel,
        out_shape=jax.ShapeDtypeStruct((M, D), jnp.float32),
        grid=(M // tm,),
        in_specs=[row_spec] * len(row_args) + [vec_spec, vec_spec],
        out_specs=row_spec,
        compiler_params=pltpu.CompilerParams(dimension_semantics=("parallel",)),
    )(*row_args, g.reshape(1, D), b.reshape(1, D))


def add_layernorm(x2d, r2d, g, b):
    M, D = x2d.shape
    return _ln_call(_add_layernorm_kernel, (x2d, r2d), g, b, M, D)


def layernorm(x2d, g, b):
    M, D = x2d.shape
    return _ln_call(_layernorm_kernel, (x2d,), g, b, M, D)


# ----------------------------- multi-head differential attention (flash-style) -----------------------------

def _mh_diff_attn_kernel(lam_ref, q_ref, k_ref, vw_ref, bias_ref, o_ref,
                         m1, l1, m2, l2, acc1, acc2, *, scale, dq):
    h = pl.program_id(2)
    kv = pl.program_id(3)

    @pl.when(kv == 0)
    def _():
        m1[...] = jnp.full_like(m1, -jnp.inf)
        m2[...] = jnp.full_like(m2, -jnp.inf)
        l1[...] = jnp.zeros_like(l1)
        l2[...] = jnp.zeros_like(l2)
        acc1[...] = jnp.zeros_like(acc1)
        acc2[...] = jnp.zeros_like(acc2)

    q = q_ref[0]                                        # (tq, D)  = [Q1 | Q2]  (bf16)
    k = k_ref[0]                                        # (tkv, D) = [K1 | K2]  (bf16)
    vw = vw_ref[0]                                      # (tkv, D) value path folded to (D,D)/head
    q1 = (q[:, :dq] * scale).astype(jnp.bfloat16)       # pre-scale q: S*dq work, not S*S
    q2 = (q[:, dq:] * scale).astype(jnp.bfloat16)
    k1 = k[:, :dq].astype(jnp.bfloat16)
    k2 = k[:, dq:].astype(jnp.bfloat16)

    s1 = jnp.dot(q1, k1.T, preferred_element_type=jnp.float32)    # (tq, tkv)
    s2 = jnp.dot(q2, k2.T, preferred_element_type=jnp.float32)

    def _online(s, m, l, acc):
        # online softmax with DEFERRED normalization (normalize once at the kv flush)
        m_new = jnp.maximum(m[...], jnp.max(s, axis=-1, keepdims=True))
        alpha = jnp.exp(m[...] - m_new)
        p = jnp.exp(s - m_new)
        l[...] = alpha * l[...] + jnp.sum(p, axis=-1, keepdims=True)
        acc[...] = alpha * acc[...] + jnp.dot(p.astype(vw.dtype), vw,
                                              preferred_element_type=jnp.float32)
        m[...] = m_new

    _online(s1, m1, l1, acc1)
    _online(s2, m2, l2, acc2)

    @pl.when(kv == pl.num_programs(3) - 1)
    def _():
        lam = lam_ref[h]                                # scalar read from SMEM
        # exact division in the epilogue (cheap: once per head, on (tq,D)) — the two
        # softmaxes are subtracted, so we avoid the approximate-reciprocal error there.
        head_out = acc1[...] / l1[...] - lam * (acc2[...] / l2[...])

        @pl.when(h == 0)
        def _():
            o_ref[0] = head_out + bias_ref[...]

        @pl.when(h > 0)
        def _():
            o_ref[0] += head_out


def mh_diff_attention(qkv, vw, attn_b, lambdas, head_dim):
    B, S, qkv_width = qkv.shape
    n_heads = lambdas.shape[0]
    d_model = vw.shape[-1] // n_heads
    assert qkv_width == 2 * d_model * n_heads
    # Lane-dense per-head chunks (width D and 2D) need 128-multiple widths.
    assert n_heads == 1 or d_model % 128 == 0, \
        "d_model must be a multiple of 128 for lane-dense per-head blocks"
    dq = d_model // 2
    tq = _pick_tile(S, (256, 128))
    tkv = _pick_tile(S, (256, 128))
    kernel = functools.partial(_mh_diff_attn_kernel,
                               scale=1.0 / math.sqrt(head_dim), dq=dq)
    return pl.pallas_call(
        kernel,
        out_shape=jax.ShapeDtypeStruct((B, S, d_model), jnp.float32),
        grid=(B, S // tq, n_heads, S // tkv),
        in_specs=[
            pl.BlockSpec(memory_space=pltpu.MemorySpace.SMEM),                  # per-head lambdas
            pl.BlockSpec((1, tq, d_model), lambda b, qi, h, kv: (b, qi, 2 * h)),      # Q half
            pl.BlockSpec((1, tkv, d_model), lambda b, qi, h, kv: (b, kv, 2 * h + 1)),  # K half
            pl.BlockSpec((1, tkv, d_model), lambda b, qi, h, kv: (b, kv, h)),          # folded V
            pl.BlockSpec((1, d_model), lambda b, qi, h, kv: (0, 0)),                   # fused bias
        ],
        out_specs=pl.BlockSpec((1, tq, d_model), lambda b, qi, h, kv: (b, qi, 0)),
        scratch_shapes=[pltpu.VMEM((tq, 1), jnp.float32)] * 4
                     + [pltpu.VMEM((tq, d_model), jnp.float32)] * 2,
        compiler_params=pltpu.CompilerParams(
            dimension_semantics=("parallel", "parallel", "arbitrary", "arbitrary"),
            vmem_limit_bytes=_VMEM_LIMIT),
    )(lambdas, qkv, qkv, vw, attn_b.reshape(1, d_model))


# ----------------------------- model forward (glue in JAX) -----------------------------

def _layer_forward(x, lp, head_dim):
    B, S, D = x.shape
    x2d = x.reshape(B * S, D)
    qkv = linear(x2d, lp["qkv_w"], lp["qkv_b"], out_dtype=jnp.bfloat16).reshape(B, S, -1)
    vw = linear(x2d, lp["vw_w"], lp["vw_b"], out_dtype=jnp.bfloat16).reshape(B, S, -1)
    mha = mh_diff_attention(qkv, vw, lp["attn_b"], lp["lambdas"], head_dim)
    h1 = add_layernorm(x2d, mha.reshape(B * S, D), lp["norm1_g"], lp["norm1_b"])
    f = ffn(h1, lp["ffn1_w"], lp["ffn1_b"], lp["ffn2_w"], lp["ffn2_b"])
    out = add_layernorm(h1, f, lp["norm2_g"], lp["norm2_b"])
    return out.reshape(B, S, D)


def prepare_params(params, d_model, n_heads, lambda_init):
    """Fold per-head weights into fused per-layer tensors (done once, outside jit)."""
    # layer_index defaults to 0 in the reference MultiHeadDifferentialAttention.
    lam_decay = lambda_init - 0.6 * math.exp(-0.3 * 0)
    layers = []
    for lp in params["layers"]:
        heads = lp["heads"]
        mha_w, mha_b = lp["mha_out_w"], lp["mha_out_b"]
        lams, vw_blocks = [], []
        attn_b = mha_b
        for h in range(n_heads):
            hd = heads[h]
            mw_h = mha_w[h * d_model:(h + 1) * d_model]             # (D, D)
            lam = (jnp.exp(jnp.sum(hd["lambda_q1"] * hd["lambda_k1"]))
                   - jnp.exp(jnp.sum(hd["lambda_q2"] * hd["lambda_k2"])) + lam_decay)
            lams.append(lam)
            # Fold the whole value path:
            #   (diff @ (x@Vw + 1*vb)) @ Ow @ Mw_h + 1*(ob @ Mw_h)
            # = diff @ (x @ (Vw@Ow@Mw_h)) + 1*[(1-lam)*(vb@Ow@Mw_h) + ob@Mw_h]
            # using diff @ 1 = (1 - lam) * 1 (softmax row sums).
            ow_mw = hd["out_w"] @ mw_h                               # (2*D*nh, D)
            vw_blocks.append(hd["v_w"] @ ow_mw)                      # (D, D)
            attn_b = attn_b + (1.0 - lam) * (hd["v_b"] @ ow_mw) + hd["out_b"] @ mw_h
        layers.append(dict(
            qkv_w=jnp.concatenate([h_["qkv_w"] for h_ in heads], axis=1).astype(jnp.bfloat16),
            qkv_b=jnp.concatenate([h_["qkv_b"] for h_ in heads], axis=0),
            vw_w=jnp.concatenate(vw_blocks, axis=1).astype(jnp.bfloat16),
            vw_b=jnp.zeros((d_model * n_heads,), jnp.float32),
            lambdas=jnp.stack(lams).astype(jnp.float32),
            attn_b=attn_b.astype(jnp.float32),
            norm1_g=lp["norm1_g"], norm1_b=lp["norm1_b"],
            norm2_g=lp["norm2_g"], norm2_b=lp["norm2_b"],
            ffn1_w=lp["ffn1_w"].astype(jnp.bfloat16), ffn1_b=lp["ffn1_b"],
            ffn2_w=lp["ffn2_w"].astype(jnp.bfloat16), ffn2_b=lp["ffn2_b"],
        ))
    return dict(embedding=params["embedding"], pos_enc=params["pos_enc"], layers=layers,
                norm_g=params["norm_g"], norm_b=params["norm_b"],
                outp_w=params["outp_w"].astype(jnp.bfloat16), outp_b=params["outp_b"])


def make_forward(params, d_model, n_heads, vocab_size, lambda_init):
    head_dim = d_model // n_heads
    prepared = prepare_params(params, d_model, n_heads, lambda_init)

    def forward(tokens):
        B, S = tokens.shape
        # Embedding gather + positional-encoding add stay in XLA (gather has no clean BlockSpec).
        x = prepared["embedding"][tokens] + prepared["pos_enc"][:, :S, :]
        for lp in prepared["layers"]:
            x = _layer_forward(x, lp, head_dim)
        x2d = layernorm(x.reshape(B * S, d_model), prepared["norm_g"], prepared["norm_b"])
        logits = linear(x2d, prepared["outp_w"], prepared["outp_b"])
        return logits.reshape(B, S, vocab_size)

    return jax.jit(forward)


# ----------------------------- parameter init (mirrors the PyTorch module) -----------------------------

def _init_linear(key, d_in, d_out):
    kw, kb = jax.random.split(key)
    bound = 1.0 / math.sqrt(d_in)
    w = jax.random.uniform(kw, (d_in, d_out), jnp.float32, -bound, bound)
    b = jax.random.uniform(kb, (d_out,), jnp.float32, -bound, bound)
    return w, b


def _init_head(key, d_model, n_heads):
    head_dim = d_model // n_heads
    ks = jax.random.split(key, 7)
    qkv_w, qkv_b = _init_linear(ks[0], d_model, 2 * d_model)
    v_w, v_b = _init_linear(ks[1], d_model, 2 * d_model * n_heads)
    out_w, out_b = _init_linear(ks[2], 2 * d_model * n_heads, d_model)
    return dict(
        qkv_w=qkv_w, qkv_b=qkv_b, v_w=v_w, v_b=v_b, out_w=out_w, out_b=out_b,
        lambda_q1=jax.random.normal(ks[3], (head_dim,), jnp.float32),
        lambda_k1=jax.random.normal(ks[4], (head_dim,), jnp.float32),
        lambda_q2=jax.random.normal(ks[5], (head_dim,), jnp.float32),
        lambda_k2=jax.random.normal(ks[6], (head_dim,), jnp.float32),
    )


def _init_layer(key, d_model, n_heads):
    ks = jax.random.split(key, n_heads + 3)
    heads = [_init_head(ks[h], d_model, n_heads) for h in range(n_heads)]
    mha_out_w, mha_out_b = _init_linear(ks[n_heads], d_model * n_heads, d_model)
    ffn1_w, ffn1_b = _init_linear(ks[n_heads + 1], d_model, 4 * d_model)
    ffn2_w, ffn2_b = _init_linear(ks[n_heads + 2], 4 * d_model, d_model)
    return dict(
        heads=heads, mha_out_w=mha_out_w, mha_out_b=mha_out_b,
        norm1_g=jnp.ones((d_model,), jnp.float32), norm1_b=jnp.zeros((d_model,), jnp.float32),
        norm2_g=jnp.ones((d_model,), jnp.float32), norm2_b=jnp.zeros((d_model,), jnp.float32),
        ffn1_w=ffn1_w, ffn1_b=ffn1_b, ffn2_w=ffn2_w, ffn2_b=ffn2_b,
    )


def _positional_encoding(max_seq_len, d_model):
    position = jnp.arange(max_seq_len, dtype=jnp.float32)[:, None]
    div_term = jnp.exp(jnp.arange(0, d_model, 2, dtype=jnp.float32)
                       * (-math.log(10000.0) / d_model))
    pe = jnp.zeros((max_seq_len, d_model), jnp.float32)
    pe = pe.at[:, 0::2].set(jnp.sin(position * div_term))
    pe = pe.at[:, 1::2].set(jnp.cos(position * div_term))
    return pe[None]


def init_params(key, d_model, n_heads, num_layers, vocab_size, max_seq_len):
    ks = jax.random.split(key, num_layers + 2)
    layers = [_init_layer(ks[i], d_model, n_heads) for i in range(num_layers)]
    embedding = jax.random.normal(ks[num_layers], (vocab_size, d_model), jnp.float32)
    outp_w, outp_b = _init_linear(ks[num_layers + 1], d_model, vocab_size)
    return dict(
        embedding=embedding,
        pos_enc=_positional_encoding(max_seq_len, d_model),
        layers=layers,
        norm_g=jnp.ones((d_model,), jnp.float32), norm_b=jnp.zeros((d_model,), jnp.float32),
        outp_w=outp_w, outp_b=outp_b,
    )


# ----------------------------- main -----------------------------

if __name__ == "__main__":
    d_model = 128         # multiple of 128 -> lane-dense per-head q/k/vw blocks
    n_heads = 2
    num_layers = 2
    vocab_size = 64
    max_seq_len = 16
    lambda_init = 0.5
    batch, seq = 2, 8

    key = jax.random.PRNGKey(0)
    pkey, tkey = jax.random.split(key)
    params = init_params(pkey, d_model, n_heads, num_layers, vocab_size, max_seq_len)
    tokens = jax.random.randint(tkey, (batch, seq), 0, vocab_size, dtype=jnp.int32)

    forward = make_forward(params, d_model, n_heads, vocab_size, lambda_init)
    logits = forward(tokens)
    jax.block_until_ready(logits)

    assert logits.shape == (batch, seq, vocab_size), logits.shape
    assert bool(jnp.all(jnp.isfinite(logits)))
    print("KERNEL_OK")
</pallas_src>

<mosaic_0001>
module attributes {stable_mosaic.version = 11 : i64} {
  func.func @_linear_kernel(%arg0: i32, %arg1: i32, %arg2: i32, %arg3: memref<16x128xf32, #tpu.memory_space<vmem>>, %arg4: memref<128x256xbf16, #tpu.memory_space<vmem>>, %arg5: memref<1x256xf32, #tpu.memory_space<vmem>>, %arg6: memref<16x256xbf16, #tpu.memory_space<vmem>>, %arg7: memref<16x256xf32, #tpu.memory_space<vmem>>) attributes {dimension_semantics = [#tpu.dimension_semantics<parallel>, #tpu.dimension_semantics<parallel>, #tpu.dimension_semantics<arbitrary>], iteration_bounds = array<i64: 1, 1, 1>, scalar_prefetch = 0 : i64, scratch_operands = 1 : i64, tpu.core_type = #tpu.core_type<tc>, window_params = [{transform_indices = @transform_0, window_bounds = array<i64: 16, 128>}, {transform_indices = @transform_1, window_bounds = array<i64: 128, 256>}, {transform_indices = @transform_2, window_bounds = array<i64: 1, 256>}, {transform_indices = @transform_3, window_bounds = array<i64: 16, 256>}]} {
    %c0_i32 = arith.constant 0 : i32
    %0 = arith.cmpi eq, %arg2, %c0_i32 : i32
    %1 = arith.extui %0 : i1 to i32
    %c0_i32_0 = arith.constant 0 : i32
    %2 = arith.cmpi ne, %1, %c0_i32_0 : i32
    scf.if %2 {
      %cst_10 = arith.constant 0.000000e+00 : f32
      %13 = vector.broadcast %cst_10 : f32 to vector<16x256xf32>
      %c0_11 = arith.constant 0 : index
      %c0_12 = arith.constant 0 : index
      %14 = vector.load %arg7[%c0_11, %c0_12] : memref<16x256xf32, #tpu.memory_space<vmem>>, vector<16x256xf32>
      tpu.vector_store %arg7[%c0_11, %c0_12], %13 {strides = array<i32>} : memref<16x256xf32, #tpu.memory_space<vmem>>, vector<16x256xf32>,
    } else {
    }
    %c0 = arith.constant 0 : index
    %c0_1 = arith.constant 0 : index
    %3 = vector.load %arg7[%c0, %c0_1] : memref<16x256xf32, #tpu.memory_space<vmem>>, vector<16x256xf32>
    %c0_2 = arith.constant 0 : index
    %c0_3 = arith.constant 0 : index
    %4 = vector.load %arg3[%c0_2, %c0_3] : memref<16x128xf32, #tpu.memory_space<vmem>>, vector<16x128xf32>
    %5 = arith.truncf %4 : vector<16x128xf32> to vector<16x128xbf16>
    %c0_4 = arith.constant 0 : index
    %c0_5 = arith.constant 0 : index
    %6 = vector.load %arg4[%c0_4, %c0_5] : memref<128x256xbf16, #tpu.memory_space<vmem>>, vector<128x256xbf16>
    %cst = arith.constant dense<0.000000e+00> : vector<16x256xf32>
    %7 = tpu.matmul %5, %6, %cst {dimension_numbers = #tpu.dot_dimension_numbers<[1], [0], [0], [1], [0, 0, 1, 1], [], []>} : vector<16x128xbf16>, vector<128x256xbf16>, vector<16x256xf32> -> vector<16x256xf32>
    %8 = arith.addf %3, %7 : vector<16x256xf32>
    %c0_6 = arith.constant 0 : index
    %c0_7 = arith.constant 0 : index
    %9 = vector.load %arg7[%c0_6, %c0_7] : memref<16x256xf32, #tpu.memory_space<vmem>>, vector<16x256xf32>
    tpu.vector_store %arg7[%c0_6, %c0_7], %8 {strides = array<i32>} : memref<16x256xf32, #tpu.memory_space<vmem>>, vector<16x256xf32>,
    %c0_i32_8 = arith.constant 0 : i32
    %10 = arith.cmpi eq, %arg2, %c0_i32_8 : i32
    %11 = arith.extui %10 : i1 to i32
    %c0_i32_9 = arith.constant 0 : i32
    %12 = arith.cmpi ne, %11, %c0_i32_9 : i32
    scf.if %12 {
      %c0_10 = arith.constant 0 : index
      %c0_11 = arith.constant 0 : index
      %13 = vector.load %arg7[%c0_10, %c0_11] : memref<16x256xf32, #tpu.memory_space<vmem>>, vector<16x256xf32>
      %c0_12 = arith.constant 0 : index
      %c0_13 = arith.constant 0 : index
      %14 = vector.load %arg5[%c0_12, %c0_13] : memref<1x256xf32, #tpu.memory_space<vmem>>, vector<1x256xf32>
      %15 = vector.broadcast %14 : vector<1x256xf32> to vector<16x256xf32>
      %16 = arith.addf %13, %15 : vector<16x256xf32>
      %17 = arith.truncf %16 : vector<16x256xf32> to vector<16x256xbf16>
      %c0_14 = arith.constant 0 : index
      %c0_15 = arith.constant 0 : index
      %18 = vector.load %arg6[%c0_14, %c0_15] : memref<16x256xbf16, #tpu.memory_space<vmem>>, vector<16x256xbf16>
      tpu.vector_store %arg6[%c0_14, %c0_15], %17 {strides = array<i32>} : memref<16x256xbf16, #tpu.memory_space<vmem>>, vector<16x256xbf16>,
    } else {
    }
    return
  }
  func.func @transform_0(%arg0: i32, %arg1: i32, %arg2: i32) -> (i32, i32) {
    %c0_i32 = arith.constant 0 : i32
    return %arg0, %arg2 : i32, i32
  }
  func.func @transform_1(%arg0: i32, %arg1: i32, %arg2: i32) -> (i32, i32) {
    %c0_i32 = arith.constant 0 : i32
    return %arg2, %arg1 : i32, i32
  }
  func.func @transform_2(%arg0: i32, %arg1: i32, %arg2: i32) -> (i32, i32) {
    %c0_i32 = arith.constant 0 : i32
    %c0_i32_0 = arith.constant 0 : i32
    return %c0_i32, %arg1 : i32, i32
  }
  func.func @transform_3(%arg0: i32, %arg1: i32, %arg2: i32) -> (i32, i32) {
    %c0_i32 = arith.constant 0 : i32
    return %arg0, %arg1 : i32, i32
  }
}

module attributes {stable_mosaic.version = 11 : i64} {
  func.func @_linear_kernel(%arg0: i32, %arg1: i32, %arg2: i32, %arg3: memref<16x128xf32, #tpu.memory_space<vmem>>, %arg4: memref<128x512xbf16, #tpu.memory_space<vmem>>, %arg5: memref<1x512xf32, #tpu.memory_space<vmem>>, %arg6: memref<16x512xbf16, #tpu.memory_space<vmem>>, %arg7: memref<16x512xf32, #tpu.memory_space<vmem>>) attributes {dimension_semantics = [#tpu.dimension_semantics<parallel>, #tpu.dimension_semantics<parallel>, #tpu.dimension_semantics<arbitrary>], iteration_bounds = array<i64: 1, 1, 1>, scalar_prefetch = 0 : i64, scratch_operands = 1 : i64, tpu.core_type = #tpu.core_type<tc>, window_params = [{transform_indices = @transform_0, window_bounds = array<i64: 16, 128>}, {transform_indices = @transform_1, window_bounds = array<i64: 128, 512>}, {transform_indices = @transform_2, window_bounds = array<i64: 1, 512>}, {transform_indices = @transform_3, window_bounds = array<i64: 16, 512>}]} {
    %c0_i32 = arith.constant 0 : i32
    %0 = arith.cmpi eq, %arg2, %c0_i32 : i32
    %1 = arith.extui %0 : i1 to i32
    %c0_i32_0 = arith.constant 0 : i32
    %2 = arith.cmpi ne, %1, %c0_i32_0 : i32
    scf.if %2 {
      %cst_10 = arith.constant 0.000000e+00 : f32
      %13 = vector.broadcast %cst_10 : f32 to vector<16x512xf32>
      %c0_11 = arith.constant 0 : index
      %c0_12 = arith.constant 0 : index
      %14 = vector.load %arg7[%c0_11, %c0_12] : memref<16x512xf32, #tpu.memory_space<vmem>>, vector<16x512xf32>
      tpu.vector_store %arg7[%c0_11, %c0_12], %13 {strides = array<i32>} : memref<16x512xf32, #tpu.memory_space<vmem>>, vector<16x512xf32>,
    } else {
    }
    %c0 = arith.constant 0 : index
    %c0_1 = arith.constant 0 : index
    %3 = vector.load %arg7[%c0, %c0_1] : memref<16x512xf32, #tpu.memory_space<vmem>>, vector<16x512xf32>
    %c0_2 = arith.constant 0 : index
    %c0_3 = arith.constant 0 : index
    %4 = vector.load %arg3[%c0_2, %c0_3] : memref<16x128xf32, #tpu.memory_space<vmem>>, vector<16x128xf32>
    %5 = arith.truncf %4 : vector<16x128xf32> to vector<16x128xbf16>
    %c0_4 = arith.constant 0 : index
    %c0_5 = arith.constant 0 : index
    %6 = vector.load %arg4[%c0_4, %c0_5] : memref<128x512xbf16, #tpu.memory_space<vmem>>, vector<128x512xbf16>
    %cst = arith.constant dense<0.000000e+00> : vector<16x512xf32>
    %7 = tpu.matmul %5, %6, %cst {dimension_numbers = #tpu.dot_dimension_numbers<[1], [0], [0], [1], [0, 0, 1, 1], [], []>} : vector<16x128xbf16>, vector<128x512xbf16>, vector<16x512xf32> -> vector<16x512xf32>
    %8 = arith.addf %3, %7 : vector<16x512xf32>
    %c0_6 = arith.constant 0 : index
    %c0_7 = arith.constant 0 : index
    %9 = vector.load %arg7[%c0_6, %c0_7] : memref<16x512xf32, #tpu.memory_space<vmem>>, vector<16x512xf32>
    tpu.vector_store %arg7[%c0_6, %c0_7], %8 {strides = array<i32>} : memref<16x512xf32, #tpu.memory_space<vmem>>, vector<16x512xf32>,
    %c0_i32_8 = arith.constant 0 : i32
    %10 = arith.cmpi eq, %arg2, %c0_i32_8 : i32
    %11 = arith.extui %10 : i1 to i32
    %c0_i32_9 = arith.constant 0 : i32
    %12 = arith.cmpi ne, %11, %c0_i32_9 : i32
    scf.if %12 {
      %c0_10 = arith.constant 0 : index
      %c0_11 = arith.constant 0 : index
      %13 = vector.load %arg7[%c0_10, %c0_11] : memref<16x512xf32, #tpu.memory_space<vmem>>, vector<16x512xf32>
      %c0_12 = arith.constant 0 : index
      %c0_13 = arith.constant 0 : index
      %14 = vector.load %arg5[%c0_12, %c0_13] : memref<1x512xf32, #tpu.memory_space<vmem>>, vector<1x512xf32>
      %15 = vector.broadcast %14 : vector<1x512xf32> to vector<16x512xf32>
      %16 = arith.addf %13, %15 : vector<16x512xf32>
      %17 = arith.truncf %16 : vector<16x512xf32> to vector<16x512xbf16>
      %c0_14 = arith.constant 0 : index
      %c0_15 = arith.constant 0 : index
      %18 = vector.load %arg6[%c0_14, %c0_15] : memref<16x512xbf16, #tpu.memory_space<vmem>>, vector<16x512xbf16>
      tpu.vector_store %arg6[%c0_14, %c0_15], %17 {strides = array<i32>} : memref<16x512xbf16, #tpu.memory_space<vmem>>, vector<16x512xbf16>,
    } else {
    }
    return
  }
  func.func @transform_0(%arg0: i32, %arg1: i32, %arg2: i32) -> (i32, i32) {
    %c0_i32 = arith.constant 0 : i32
    return %arg0, %arg2 : i32, i32
  }
  func.func @transform_1(%arg0: i32, %arg1: i32, %arg2: i32) -> (i32, i32) {
    %c0_i32 = arith.constant 0 : i32
    return %arg2, %arg1 : i32, i32
  }
  func.func @transform_2(%arg0: i32, %arg1: i32, %arg2: i32) -> (i32, i32) {
    %c0_i32 = arith.constant 0 : i32
    %c0_i32_0 = arith.constant 0 : i32
    return %c0_i32, %arg1 : i32, i32
  }
  func.func @transform_3(%arg0: i32, %arg1: i32, %arg2: i32) -> (i32, i32) {
    %c0_i32 = arith.constant 0 : i32
    return %arg0, %arg1 : i32, i32
  }
}

module attributes {stable_mosaic.version = 11 : i64} {
  func.func @_mh_diff_attn_kernel(%arg0: i32, %arg1: i32, %arg2: i32, %arg3: i32, %arg4: memref<2xf32, #tpu.memory_space<smem>>, %arg5: memref<1x8x128xbf16, #tpu.memory_space<vmem>>, %arg6: memref<1x8x128xbf16, #tpu.memory_space<vmem>>, %arg7: memref<1x8x128xbf16, #tpu.memory_space<vmem>>, %arg8: memref<1x128xf32, #tpu.memory_space<vmem>>, %arg9: memref<1x8x128xf32, #tpu.memory_space<vmem>>, %arg10: memref<8x1xf32, #tpu.memory_space<vmem>>, %arg11: memref<8x1xf32, #tpu.memory_space<vmem>>, %arg12: memref<8x1xf32, #tpu.memory_space<vmem>>, %arg13: memref<8x1xf32, #tpu.memory_space<vmem>>, %arg14: memref<8x128xf32, #tpu.memory_space<vmem>>, %arg15: memref<8x128xf32, #tpu.memory_space<vmem>>) attributes {dimension_semantics = [#tpu.dimension_semantics<parallel>, #tpu.dimension_semantics<parallel>, #tpu.dimension_semantics<arbitrary>, #tpu.dimension_semantics<arbitrary>], iteration_bounds = array<i64: 2, 1, 2, 1>, scalar_prefetch = 0 : i64, scratch_operands = 6 : i64, tpu.core_type = #tpu.core_type<tc>, window_params = [{transform_indices = @transform_0, window_bounds = array<i64: 2>}, {transform_indices = @transform_1, window_bounds = array<i64: 1, 8, 128>}, {transform_indices = @transform_2, window_bounds = array<i64: 1, 8, 128>}, {transform_indices = @transform_3, window_bounds = array<i64: 1, 8, 128>}, {pipeline_mode = #tpu.pipeline_mode<synchronous>, transform_indices = @transform_4, window_bounds = array<i64: 1, 128>}, {transform_indices = @transform_5, window_bounds = array<i64: 1, 8, 128>}]} {
    %c0_i32 = arith.constant 0 : i32
    %0 = arith.cmpi eq, %arg3, %c0_i32 : i32
    %1 = arith.extui %0 : i1 to i32
    %c0_i32_0 = arith.constant 0 : i32
    %2 = arith.cmpi ne, %1, %c0_i32_0 : i32
    scf.if %2 {
      %cst_48 = arith.constant 0xFF800000 : f32
      %72 = vector.broadcast %cst_48 : f32 to vector<8x1xf32>
      %c0_49 = arith.constant 0 : index
      %c0_50 = arith.constant 0 : index
      %73 = vector.load %arg10[%c0_49, %c0_50] : memref<8x1xf32, #tpu.memory_space<vmem>>, vector<8x1xf32>
      tpu.vector_store %arg10[%c0_49, %c0_50], %72 {strides = array<i32>} : memref<8x1xf32, #tpu.memory_space<vmem>>, vector<8x1xf32>,
      %cst_51 = arith.constant 0xFF800000 : f32
      %74 = vector.broadcast %cst_51 : f32 to vector<8x1xf32>
      %c0_52 = arith.constant 0 : index
      %c0_53 = arith.constant 0 : index
      %75 = vector.load %arg12[%c0_52, %c0_53] : memref<8x1xf32, #tpu.memory_space<vmem>>, vector<8x1xf32>
      tpu.vector_store %arg12[%c0_52, %c0_53], %74 {strides = array<i32>} : memref<8x1xf32, #tpu.memory_space<vmem>>, vector<8x1xf32>,
      %cst_54 = arith.constant 0.000000e+00 : f32
      %76 = vector.broadcast %cst_54 : f32 to vector<8x1xf32>
      %c0_55 = arith.constant 0 : index
      %c0_56 = arith.constant 0 : index
      %77 = vector.load %arg11[%c0_55, %c0_56] : memref<8x1xf32, #tpu.memory_space<vmem>>, vector<8x1xf32>
      tpu.vector_store %arg11[%c0_55, %c0_56], %76 {strides = array<i32>} : memref<8x1xf32, #tpu.memory_space<vmem>>, vector<8x1xf32>,
      %cst_57 = arith.constant 0.000000e+00 : f32
      %78 = vector.broadcast %cst_57 : f32 to vector<8x1xf32>
      %c0_58 = arith.constant 0 : index
      %c0_59 = arith.constant 0 : index
      %79 = vector.load %arg13[%c0_58, %c0_59] : memref<8x1xf32, #tpu.memory_space<vmem>>, vector<8x1xf32>
      tpu.vector_store %arg13[%c0_58, %c0_59], %78 {strides = array<i32>} : memref<8x1xf32, #tpu.memory_space<vmem>>, vector<8x1xf32>,
      %cst_60 = arith.constant 0.000000e+00 : f32
      %80 = vector.broadcast %cst_60 : f32 to vector<8x128xf32>
      %c0_61 = arith.constant 0 : index
      %c0_62 = arith.constant 0 : index
      %81 = vector.load %arg14[%c0_61, %c0_62] : memref<8x128xf32, #tpu.memory_space<vmem>>, vector<8x128xf32>
      tpu.vector_store %arg14[%c0_61, %c0_62], %80 {strides = array<i32>} : memref<8x128xf32, #tpu.memory_space<vmem>>, vector<8x128xf32>,
      %cst_63 = arith.constant 0.000000e+00 : f32
      %82 = vector.broadcast %cst_63 : f32 to vector<8x128xf32>
      %c0_64 = arith.constant 0 : index
      %c0_65 = arith.constant 0 : index
      %83 = vector.load %arg15[%c0_64, %c0_65] : memref<8x128xf32, #tpu.memory_space<vmem>>, vector<8x128xf32>
      tpu.vector_store %arg15[%c0_64, %c0_65], %82 {strides = array<i32>} : memref<8x128xf32, #tpu.memory_space<vmem>>, vector<8x128xf32>,
    } else {
    }
    %c0 = arith.constant 0 : index
    %c0_1 = arith.constant 0 : index
    %c0_2 = arith.constant 0 : index
    %3 = vector.load %arg5[%c0, %c0_1, %c0_2] : memref<1x8x128xbf16, #tpu.memory_space<vmem>>, vector<1x8x128xbf16>
    %4 = vector.shape_cast %3 : vector<1x8x128xbf16> to vector<8x128xbf16>
    %c0_3 = arith.constant 0 : index
    %c0_4 = arith.constant 0 : index
    %c0_5 = arith.constant 0 : index
    %5 = vector.load %arg6[%c0_3, %c0_4, %c0_5] : memref<1x8x128xbf16, #tpu.memory_space<vmem>>, vector<1x8x128xbf16>
    %6 = vector.shape_cast %5 : vector<1x8x128xbf16> to vector<8x128xbf16>
    %c0_6 = arith.constant 0 : index
    %c0_7 = arith.constant 0 : index
    %c0_8 = arith.constant 0 : index
    %7 = vector.load %arg7[%c0_6, %c0_7, %c0_8] : memref<1x8x128xbf16, #tpu.memory_space<vmem>>, vector<1x8x128xbf16>
    %8 = vector.shape_cast %7 : vector<1x8x128xbf16> to vector<8x128xbf16>
    %9 = vector.extract_strided_slice %4 {offsets = [0, 0], sizes = [8, 64], strides = [1, 1]} : vector<8x128xbf16> to vector<8x64xbf16>
    %cst = arith.constant 1.250000e-01 : bf16
    %10 = vector.broadcast %cst : bf16 to vector<8x64xbf16>
    %11 = arith.mulf %9, %10 : vector<8x64xbf16>
    %12 = vector.extract_strided_slice %4 {offsets = [0, 64], sizes = [8, 64], strides = [1, 1]} : vector<8x128xbf16> to vector<8x64xbf16>
    %cst_9 = arith.constant 1.250000e-01 : bf16
    %13 = vector.broadcast %cst_9 : bf16 to vector<8x64xbf16>
    %14 = arith.mulf %12, %13 : vector<8x64xbf16>
    %15 = vector.extract_strided_slice %6 {offsets = [0, 0], sizes = [8, 64], strides = [1, 1]} : vector<8x128xbf16> to vector<8x64xbf16>
    %16 = vector.extract_strided_slice %6 {offsets = [0, 64], sizes = [8, 64], strides = [1, 1]} : vector<8x128xbf16> to vector<8x64xbf16>
    %17 = tpu.transpose %15, [1, 0] : vector<8x64xbf16> -> vector<64x8xbf16>
    %cst_10 = arith.constant dense<0.000000e+00> : vector<8x8xf32>
    %18 = tpu.matmul %11, %17, %cst_10 {dimension_numbers = #tpu.dot_dimension_numbers<[1], [0], [0], [1], [0, 0, 1, 1], [], []>} : vector<8x64xbf16>, vector<64x8xbf16>, vector<8x8xf32> -> vector<8x8xf32>
    %19 = tpu.transpose %16, [1, 0] : vector<8x64xbf16> -> vector<64x8xbf16>
    %cst_11 = arith.constant dense<0.000000e+00> : vector<8x8xf32>
    %20 = tpu.matmul %14, %19, %cst_11 {dimension_numbers = #tpu.dot_dimension_numbers<[1], [0], [0], [1], [0, 0, 1, 1], [], []>} : vector<8x64xbf16>, vector<64x8xbf16>, vector<8x8xf32> -> vector<8x8xf32>
    %c0_12 = arith.constant 0 : index
    %c0_13 = arith.constant 0 : index
    %21 = vector.load %arg10[%c0_12, %c0_13] : memref<8x1xf32, #tpu.memory_space<vmem>>, vector<8x1xf32>
    %cst_14 = arith.constant dense<0xFF800000> : vector<8xf32>
    %22 = vector.multi_reduction <maximumf>, %18, %cst_14 [1] : vector<8x8xf32> to vector<8xf32>
    %23 = vector.shape_cast %22 : vector<8xf32> to vector<8x1xf32>
    %24 = arith.maximumf %21, %23 : vector<8x1xf32>
    %c0_15 = arith.constant 0 : index
    %c0_16 = arith.constant 0 : index
    %25 = vector.load %arg10[%c0_15, %c0_16] : memref<8x1xf32, #tpu.memory_space<vmem>>, vector<8x1xf32>
    %26 = arith.subf %25, %24 : vector<8x1xf32>
    %27 = math.exp %26 : vector<8x1xf32>
    %28 = vector.broadcast %24 : vector<8x1xf32> to vector<8x8xf32>
    %29 = arith.subf %18, %28 : vector<8x8xf32>
    %30 = math.exp %29 : vector<8x8xf32>
    %c0_17 = arith.constant 0 : index
    %c0_18 = arith.constant 0 : index
    %31 = vector.load %arg11[%c0_17, %c0_18] : memref<8x1xf32, #tpu.memory_space<vmem>>, vector<8x1xf32>
    %32 = arith.mulf %27, %31 : vector<8x1xf32>
    %cst_19 = arith.constant dense<0.000000e+00> : vector<8xf32>
    %33 = vector.multi_reduction <add>, %30, %cst_19 [1] : vector<8x8xf32> to vector<8xf32>
    %34 = vector.shape_cast %33 : vector<8xf32> to vector<8x1xf32>
    %35 = arith.addf %32, %34 : vector<8x1xf32>
    %c0_20 = arith.constant 0 : index
    %c0_21 = arith.constant 0 : index
    %36 = vector.load %arg11[%c0_20, %c0_21] : memref<8x1xf32, #tpu.memory_space<vmem>>, vector<8x1xf32>
    tpu.vector_store %arg11[%c0_20, %c0_21], %35 {strides = array<i32>} : memref<8x1xf32, #tpu.memory_space<vmem>>, vector<8x1xf32>,
    %c0_22 = arith.constant 0 : index
    %c0_23 = arith.constant 0 : index
    %37 = vector.load %arg14[%c0_22, %c0_23] : memref<8x128xf32, #tpu.memory_space<vmem>>, vector<8x128xf32>
    %38 = vector.broadcast %27 : vector<8x1xf32> to vector<8x128xf32>
    %39 = arith.mulf %38, %37 : vector<8x128xf32>
    %40 = arith.truncf %30 : vector<8x8xf32> to vector<8x8xbf16>
    %cst_24 = arith.constant dense<0.000000e+00> : vector<8x128xf32>
    %41 = tpu.matmul %40, %8, %cst_24 {dimension_numbers = #tpu.dot_dimension_numbers<[1], [0], [0], [1], [0, 0, 1, 1], [], []>} : vector<8x8xbf16>, vector<8x128xbf16>, vector<8x128xf32> -> vector<8x128xf32>
    %42 = arith.addf %39, %41 : vector<8x128xf32>
    %c0_25 = arith.constant 0 : index
    %c0_26 = arith.constant 0 : index
    %43 = vector.load %arg14[%c0_25, %c0_26] : memref<8x128xf32, #tpu.memory_space<vmem>>, vector<8x128xf32>
    tpu.vector_store %arg14[%c0_25, %c0_26], %42 {strides = array<i32>} : memref<8x128xf32, #tpu.memory_space<vmem>>, vector<8x128xf32>,
    %c0_27 = arith.constant 0 : index
    %c0_28 = arith.constant 0 : index
    %44 = vector.load %arg10[%c0_27, %c0_28] : memref<8x1xf32, #tpu.memory_space<vmem>>, vector<8x1xf32>
    tpu.vector_store %arg10[%c0_27, %c0_28], %24 {strides = array<i32>} : memref<8x1xf32, #tpu.memory_space<vmem>>, vector<8x1xf32>,
    %c0_29 = arith.constant 0 : index
    %c0_30 = arith.constant 0 : index
    %45 = vector.load %arg12[%c0_29, %c0_30] : memref<8x1xf32, #tpu.memory_space<vmem>>, vector<8x1xf32>
    %cst_31 = arith.constant dense<0xFF800000> : vector<8xf32>
    %46 = vector.multi_reduction <maximumf>, %20, %cst_31 [1] : vector<8x8xf32> to vector<8xf32>
    %47 = vector.shape_cast %46 : vector<8xf32> to vector<8x1xf32>
    %48 = arith.maximumf %45, %47 : vector<8x1xf32>
    %c0_32 = arith.constant 0 : index
    %c0_33 = arith.constant 0 : index
    %49 = vector.load %arg12[%c0_32, %c0_33] : memref<8x1xf32, #tpu.memory_space<vmem>>, vector<8x1xf32>
    %50 = arith.subf %49, %48 : vector<8x1xf32>
    %51 = math.exp %50 : vector<8x1xf32>
    %52 = vector.broadcast %48 : vector<8x1xf32> to vector<8x8xf32>
    %53 = arith.subf %20, %52 : vector<8x8xf32>
    %54 = math.exp %53 : vector<8x8xf32>
    %c0_34 = arith.constant 0 : index
    %c0_35 = arith.constant 0 : index
    %55 = vector.load %arg13[%c0_34, %c0_35] : memref<8x1xf32, #tpu.memory_space<vmem>>, vector<8x1xf32>
    %56 = arith.mulf %51, %55 : vector<8x1xf32>
    %cst_36 = arith.constant dense<0.000000e+00> : vector<8xf32>
    %57 = vector.multi_reduction <add>, %54, %cst_36 [1] : vector<8x8xf32> to vector<8xf32>
    %58 = vector.shape_cast %57 : vector<8xf32> to vector<8x1xf32>
    %59 = arith.addf %56, %58 : vector<8x1xf32>
    %c0_37 = arith.constant 0 : index
    %c0_38 = arith.constant 0 : index
    %60 = vector.load %arg13[%c0_37, %c0_38] : memref<8x1xf32, #tpu.memory_space<vmem>>, vector<8x1xf32>
    tpu.vector_store %arg13[%c0_37, %c0_38], %59 {strides = array<i32>} : memref<8x1xf32, #tpu.memory_space<vmem>>, vector<8x1xf32>,
    %c0_39 = arith.constant 0 : index
    %c0_40 = arith.constant 0 : index
    %61 = vector.load %arg15[%c0_39, %c0_40] : memref<8x128xf32, #tpu.memory_space<vmem>>, vector<8x128xf32>
    %62 = vector.broadcast %51 : vector<8x1xf32> to vector<8x128xf32>
    %63 = arith.mulf %62, %61 : vector<8x128xf32>
    %64 = arith.truncf %54 : vector<8x8xf32> to vector<8x8xbf16>
    %cst_41 = arith.constant dense<0.000000e+00> : vector<8x128xf32>
    %65 = tpu.matmul %64, %8, %cst_41 {dimension_numbers = #tpu.dot_dimension_numbers<[1], [0], [0], [1], [0, 0, 1, 1], [], []>} : vector<8x8xbf16>, vector<8x128xbf16>, vector<8x128xf32> -> vector<8x128xf32>
    %66 = arith.addf %63, %65 : vector<8x128xf32>
    %c0_42 = arith.constant 0 : index
    %c0_43 = arith.constant 0 : index
    %67 = vector.load %arg15[%c0_42, %c0_43] : memref<8x128xf32, #tpu.memory_space<vmem>>, vector<8x128xf32>
    tpu.vector_store %arg15[%c0_42, %c0_43], %66 {strides = array<i32>} : memref<8x128xf32, #tpu.memory_space<vmem>>, vector<8x128xf32>,
    %c0_44 = arith.constant 0 : index
    %c0_45 = arith.constant 0 : index
    %68 = vector.load %arg12[%c0_44, %c0_45] : memref<8x1xf32, #tpu.memory_space<vmem>>, vector<8x1xf32>
    tpu.vector_store %arg12[%c0_44, %c0_45], %48 {strides = array<i32>} : memref<8x1xf32, #tpu.memory_space<vmem>>, vector<8x1xf32>,
    %c0_i32_46 = arith.constant 0 : i32
    %69 = arith.cmpi eq, %arg3, %c0_i32_46 : i32
    %70 = arith.extui %69 : i1 to i32
    %c0_i32_47 = arith.constant 0 : i32
    %71 = arith.cmpi ne, %70, %c0_i32_47 : i32
    scf.if %71 {
      %72 = arith.index_cast %arg2 : i32 to index
      %73 = memref.load %arg4[%72] : memref<2xf32, #tpu.memory_space<smem>>
      %c0_48 = arith.constant 0 : index
      %c0_49 = arith.constant 0 : index
      %74 = vector.load %arg14[%c0_48, %c0_49] : memref<8x128xf32, #tpu.memory_space<vmem>>, vector<8x128xf32>
      %c0_50 = arith.constant 0 : index
      %c0_51 = arith.constant 0 : index
      %75 = vector.load %arg11[%c0_50, %c0_51] : memref<8x1xf32, #tpu.memory_space<vmem>>, vector<8x1xf32>
      %76 = vector.broadcast %75 : vector<8x1xf32> to vector<8x128xf32>
      %77 = arith.divf %74, %76 : vector<8x128xf32>
      %c0_52 = arith.constant 0 : index
      %c0_53 = arith.constant 0 : index
      %78 = vector.load %arg15[%c0_52, %c0_53] : memref<8x128xf32, #tpu.memory_space<vmem>>, vector<8x128xf32>
      %c0_54 = arith.constant 0 : index
      %c0_55 = arith.constant 0 : index
      %79 = vector.load %arg13[%c0_54, %c0_55] : memref<8x1xf32, #tpu.memory_space<vmem>>, vector<8x1xf32>
      %80 = vector.broadcast %79 : vector<8x1xf32> to vector<8x128xf32>
      %81 = arith.divf %78, %80 : vector<8x128xf32>
      %82 = vector.broadcast %73 : f32 to vector<8x128xf32>
      %83 = arith.mulf %82, %81 : vector<8x128xf32>
      %84 = arith.subf %77, %83 : vector<8x128xf32>
      %c0_i32_56 = arith.constant 0 : i32
      %85 = arith.cmpi eq, %arg2, %c0_i32_56 : i32
      %86 = arith.extui %85 : i1 to i32
      %c0_i32_57 = arith.constant 0 : i32
      %87 = arith.cmpi ne, %86, %c0_i32_57 : i32
      scf.if %87 {
        %c0_60 = arith.constant 0 : index
        %c0_61 = arith.constant 0 : index
        %91 = vector.load %arg8[%c0_60, %c0_61] : memref<1x128xf32, #tpu.memory_space<vmem>>, vector<1x128xf32>
        %92 = vector.broadcast %91 : vector<1x128xf32> to vector<8x128xf32>
        %93 = arith.addf %84, %92 : vector<8x128xf32>
        %c0_62 = arith.constant 0 : index
        %c0_63 = arith.constant 0 : index
        %c0_64 = arith.constant 0 : index
        %94 = vector.load %arg9[%c0_62, %c0_63, %c0_64] : memref<1x8x128xf32, #tpu.memory_space<vmem>>, vector<1x8x128xf32>
        %95 = vector.shape_cast %94 : vector<1x8x128xf32> to vector<8x128xf32>
        %96 = vector.shape_cast %93 : vector<8x128xf32> to vector<1x8x128xf32>
        tpu.vector_store %arg9[%c0_62, %c0_63, %c0_64], %96 {strides = array<i32>} : memref<1x8x128xf32, #tpu.memory_space<vmem>>, vector<1x8x128xf32>,
      } else {
      }
      %c0_i32_58 = arith.constant 0 : i32
      %88 = arith.cmpi sgt, %arg2, %c0_i32_58 : i32
      %89 = arith.extui %88 : i1 to i32
      %c0_i32_59 = arith.constant 0 : i32
      %90 = arith.cmpi ne, %89, %c0_i32_59 : i32
      scf.if %90 {
        %c0_60 = arith.constant 0 : index
        %c0_61 = arith.constant 0 : index
        %c0_62 = arith.constant 0 : index
        %91 = vector.load %arg9[%c0_60, %c0_61, %c0_62] : memref<1x8x128xf32, #tpu.memory_space<vmem>>, vector<1x8x128xf32>
        %92 = vector.shape_cast %91 : vector<1x8x128xf32> to vector<8x128xf32>
        %93 = arith.addf %92, %84 : vector<8x128xf32>
        %c0_63 = arith.constant 0 : index
        %c0_64 = arith.constant 0 : index
        %c0_65 = arith.constant 0 : index
        %94 = vector.load %arg9[%c0_63, %c0_64, %c0_65] : memref<1x8x128xf32, #tpu.memory_space<vmem>>, vector<1x8x128xf32>
        %95 = vector.shape_cast %94 : vector<1x8x128xf32> to vector<8x128xf32>
        %96 = vector.shape_cast %93 : vector<8x128xf32> to vector<1x8x128xf32>
        tpu.vector_store %arg9[%c0_63, %c0_64, %c0_65], %96 {strides = array<i32>} : memref<1x8x128xf32, #tpu.memory_space<vmem>>, vector<1x8x128xf32>,
      } else {
      }
    } else {
    }
    return
  }
  func.func @transform_0(%arg0: i32, %arg1: i32, %arg2: i32, %arg3: i32) -> i32 {
    %c0_i32 = arith.constant 0 : i32
    %c0_i32_0 = arith.constant 0 : i32
    return %c0_i32 : i32
  }
  func.func @transform_1(%arg0: i32, %arg1: i32, %arg2: i32, %arg3: i32) -> (i32, i32, i32) {
    %c2_i32 = arith.constant 2 : i32
    %0 = arith.muli %c2_i32, %arg2 : i32
    %c0_i32 = arith.constant 0 : i32
    return %arg0, %arg1, %0 : i32, i32, i32
  }
  func.func @transform_2(%arg0: i32, %arg1: i32, %arg2: i32, %arg3: i32) -> (i32, i32, i32) {
    %c2_i32 = arith.constant 2 : i32
    %0 = arith.muli %c2_i32, %arg2 : i32
    %c1_i32 = arith.constant 1 : i32
    %1 = arith.addi %0, %c1_i32 : i32
    %c0_i32 = arith.constant 0 : i32
    return %arg0, %arg3, %1 : i32, i32, i32
  }
  func.func @transform_3(%arg0: i32, %arg1: i32, %arg2: i32, %arg3: i32) -> (i32, i32, i32) {
    %c0_i32 = arith.constant 0 : i32
    return %arg0, %arg3, %arg2 : i32, i32, i32
  }
  func.func @transform_4(%arg0: i32, %arg1: i32, %arg2: i32, %arg3: i32) -> (i32, i32) {
    %c0_i32 = arith.constant 0 : i32
    %c0_i32_0 = arith.constant 0 : i32
    %c0_i32_1 = arith.constant 0 : i32
    return %c0_i32, %c0_i32_0 : i32, i32
  }
  func.func @transform_5(%arg0: i32, %arg1: i32, %arg2: i32, %arg3: i32) -> (i32, i32, i32) {
    %c0_i32 = arith.constant 0 : i32
    %c0_i32_0 = arith.constant 0 : i32
    return %arg0, %arg1, %c0_i32 : i32, i32, i32
  }
}

module attributes {stable_mosaic.version = 11 : i64} {
  func.func @_add_layernorm_kernel(%arg0: i32, %arg1: memref<16x128xf32, #tpu.memory_space<vmem>>, %arg2: memref<16x128xf32, #tpu.memory_space<vmem>>, %arg3: memref<1x128xf32, #tpu.memory_space<vmem>>, %arg4: memref<1x128xf32, #tpu.memory_space<vmem>>, %arg5: memref<16x128xf32, #tpu.memory_space<vmem>>) attributes {dimension_semantics = [#tpu.dimension_semantics<parallel>], iteration_bounds = array<i64: 1>, scalar_prefetch = 0 : i64, scratch_operands = 0 : i64, tpu.core_type = #tpu.core_type<tc>, window_params = [{transform_indices = @transform_0, window_bounds = array<i64: 16, 128>}, {transform_indices = @transform_1, window_bounds = array<i64: 16, 128>}, {pipeline_mode = #tpu.pipeline_mode<synchronous>, transform_indices = @transform_2, window_bounds = array<i64: 1, 128>}, {pipeline_mode = #tpu.pipeline_mode<synchronous>, transform_indices = @transform_3, window_bounds = array<i64: 1, 128>}, {transform_indices = @transform_4, window_bounds = array<i64: 16, 128>}]} {
    %c0 = arith.constant 0 : index
    %c0_0 = arith.constant 0 : index
    %0 = vector.load %arg1[%c0, %c0_0] : memref<16x128xf32, #tpu.memory_space<vmem>>, vector<16x128xf32>
    %c0_1 = arith.constant 0 : index
    %c0_2 = arith.constant 0 : index
    %1 = vector.load %arg2[%c0_1, %c0_2] : memref<16x128xf32, #tpu.memory_space<vmem>>, vector<16x128xf32>
    %2 = arith.addf %0, %1 : vector<16x128xf32>
    %c0_3 = arith.constant 0 : index
    %c0_4 = arith.constant 0 : index
    %3 = vector.load %arg3[%c0_3, %c0_4] : memref<1x128xf32, #tpu.memory_space<vmem>>, vector<1x128xf32>
    %c0_5 = arith.constant 0 : index
    %c0_6 = arith.constant 0 : index
    %4 = vector.load %arg4[%c0_5, %c0_6] : memref<1x128xf32, #tpu.memory_space<vmem>>, vector<1x128xf32>
    %cst = arith.constant dense<0.000000e+00> : vector<16xf32>
    %5 = vector.multi_reduction <add>, %2, %cst [1] : vector<16x128xf32> to vector<16xf32>
    %6 = vector.shape_cast %5 : vector<16xf32> to vector<16x1xf32>
    %cst_7 = arith.constant 1.280000e+02 : f32
    %7 = vector.broadcast %cst_7 : f32 to vector<16x1xf32>
    %8 = arith.divf %6, %7 : vector<16x1xf32>
    %9 = vector.broadcast %8 : vector<16x1xf32> to vector<16x128xf32>
    %10 = arith.subf %2, %9 : vector<16x128xf32>
    %11 = arith.mulf %10, %10 : vector<16x128xf32>
    %cst_8 = arith.constant dense<0.000000e+00> : vector<16xf32>
    %12 = vector.multi_reduction <add>, %11, %cst_8 [1] : vector<16x128xf32> to vector<16xf32>
    %13 = vector.shape_cast %12 : vector<16xf32> to vector<16x1xf32>
    %cst_9 = arith.constant 1.280000e+02 : f32
    %14 = vector.broadcast %cst_9 : f32 to vector<16x1xf32>
    %15 = arith.divf %13, %14 : vector<16x1xf32>
    %cst_10 = arith.constant 9.99999974E-6 : f32
    %16 = vector.broadcast %cst_10 : f32 to vector<16x1xf32>
    %17 = arith.addf %15, %16 : vector<16x1xf32>
    %18 = math.rsqrt %17 : vector<16x1xf32>
    %19 = vector.broadcast %18 : vector<16x1xf32> to vector<16x128xf32>
    %20 = arith.mulf %10, %19 : vector<16x128xf32>
    %21 = vector.broadcast %3 : vector<1x128xf32> to vector<16x128xf32>
    %22 = arith.mulf %20, %21 : vector<16x128xf32>
    %23 = vector.broadcast %4 : vector<1x128xf32> to vector<16x128xf32>
    %24 = arith.addf %22, %23 : vector<16x128xf32>
    %c0_11 = arith.constant 0 : index
    %c0_12 = arith.constant 0 : index
    %25 = vector.load %arg5[%c0_11, %c0_12] : memref<16x128xf32, #tpu.memory_space<vmem>>, vector<16x128xf32>
    tpu.vector_store %arg5[%c0_11, %c0_12], %24 {strides = array<i32>} : memref<16x128xf32, #tpu.memory_space<vmem>>, vector<16x128xf32>,
    return
  }
  func.func @transform_0(%arg0: i32) -> (i32, i32) {
    %c0_i32 = arith.constant 0 : i32
    %c0_i32_0 = arith.constant 0 : i32
    return %arg0, %c0_i32 : i32, i32
  }
  func.func @transform_1(%arg0: i32) -> (i32, i32) {
    %c0_i32 = arith.constant 0 : i32
    %c0_i32_0 = arith.constant 0 : i32
    return %arg0, %c0_i32 : i32, i32
  }
  func.func @transform_2(%arg0: i32) -> (i32, i32) {
    %c0_i32 = arith.constant 0 : i32
    %c0_i32_0 = arith.constant 0 : i32
    %c0_i32_1 = arith.constant 0 : i32
    return %c0_i32, %c0_i32_0 : i32, i32
  }
  func.func @transform_3(%arg0: i32) -> (i32, i32) {
    %c0_i32 = arith.constant 0 : i32
    %c0_i32_0 = arith.constant 0 : i32
    %c0_i32_1 = arith.constant 0 : i32
    return %c0_i32, %c0_i32_0 : i32, i32
  }
  func.func @transform_4(%arg0: i32) -> (i32, i32) {
    %c0_i32 = arith.constant 0 : i32
    %c0_i32_0 = arith.constant 0 : i32
    return %arg0, %c0_i32 : i32, i32
  }
}

module attributes {stable_mosaic.version = 11 : i64} {
  func.func @_ffn_kernel(%arg0: i32, %arg1: i32, %arg2: memref<16x128xf32, #tpu.memory_space<vmem>>, %arg3: memref<128x512xbf16, #tpu.memory_space<vmem>>, %arg4: memref<1x512xf32, #tpu.memory_space<vmem>>, %arg5: memref<512x128xbf16, #tpu.memory_space<vmem>>, %arg6: memref<1x128xf32, #tpu.memory_space<vmem>>, %arg7: memref<16x128xf32, #tpu.memory_space<vmem>>, %arg8: memref<16x128xf32, #tpu.memory_space<vmem>>) attributes {dimension_semantics = [#tpu.dimension_semantics<parallel>, #tpu.dimension_semantics<arbitrary>], iteration_bounds = array<i64: 1, 1>, scalar_prefetch = 0 : i64, scratch_operands = 1 : i64, tpu.core_type = #tpu.core_type<tc>, window_params = [{transform_indices = @transform_0, window_bounds = array<i64: 16, 128>}, {transform_indices = @transform_1, window_bounds = array<i64: 128, 512>}, {transform_indices = @transform_2, window_bounds = array<i64: 1, 512>}, {transform_indices = @transform_3, window_bounds = array<i64: 512, 128>}, {pipeline_mode = #tpu.pipeline_mode<synchronous>, transform_indices = @transform_4, window_bounds = array<i64: 1, 128>}, {transform_indices = @transform_5, window_bounds = array<i64: 16, 128>}]} {
    %c0_i32 = arith.constant 0 : i32
    %0 = arith.cmpi eq, %arg1, %c0_i32 : i32
    %1 = arith.extui %0 : i1 to i32
    %c0_i32_0 = arith.constant 0 : i32
    %2 = arith.cmpi ne, %1, %c0_i32_0 : i32
    scf.if %2 {
      %cst_19 = arith.constant 0.000000e+00 : f32
      %32 = vector.broadcast %cst_19 : f32 to vector<16x128xf32>
      %c0_20 = arith.constant 0 : index
      %c0_21 = arith.constant 0 : index
      %33 = vector.load %arg8[%c0_20, %c0_21] : memref<16x128xf32, #tpu.memory_space<vmem>>, vector<16x128xf32>
      tpu.vector_store %arg8[%c0_20, %c0_21], %32 {strides = array<i32>} : memref<16x128xf32, #tpu.memory_space<vmem>>, vector<16x128xf32>,
    } else {
    }
    %c0 = arith.constant 0 : index
    %c0_1 = arith.constant 0 : index
    %3 = vector.load %arg2[%c0, %c0_1] : memref<16x128xf32, #tpu.memory_space<vmem>>, vector<16x128xf32>
    %4 = arith.truncf %3 : vector<16x128xf32> to vector<16x128xbf16>
    %c0_2 = arith.constant 0 : index
    %c0_3 = arith.constant 0 : index
    %5 = vector.load %arg3[%c0_2, %c0_3] : memref<128x512xbf16, #tpu.memory_space<vmem>>, vector<128x512xbf16>
    %cst = arith.constant dense<0.000000e+00> : vector<16x512xf32>
    %6 = tpu.matmul %4, %5, %cst {dimension_numbers = #tpu.dot_dimension_numbers<[1], [0], [0], [1], [0, 0, 1, 1], [], []>} : vector<16x128xbf16>, vector<128x512xbf16>, vector<16x512xf32> -> vector<16x512xf32>
    %c0_4 = arith.constant 0 : index
    %c0_5 = arith.constant 0 : index
    %7 = vector.load %arg4[%c0_4, %c0_5] : memref<1x512xf32, #tpu.memory_space<vmem>>, vector<1x512xf32>
    %8 = vector.broadcast %7 : vector<1x512xf32> to vector<16x512xf32>
    %9 = arith.addf %6, %8 : vector<16x512xf32>
    %cst_6 = arith.constant 5.000000e-01 : f32
    %10 = vector.broadcast %cst_6 : f32 to vector<16x512xf32>
    %11 = arith.mulf %10, %9 : vector<16x512xf32>
    %cst_7 = arith.constant 4.471500e-02 : f32
    %12 = vector.broadcast %cst_7 : f32 to vector<16x512xf32>
    %13 = arith.mulf %12, %9 : vector<16x512xf32>
    %14 = arith.mulf %13, %9 : vector<16x512xf32>
    %15 = arith.mulf %14, %9 : vector<16x512xf32>
    %16 = arith.addf %9, %15 : vector<16x512xf32>
    %cst_8 = arith.constant 0.797884583 : f32
    %17 = vector.broadcast %cst_8 : f32 to vector<16x512xf32>
    %18 = arith.mulf %17, %16 : vector<16x512xf32>
    %19 = math.tanh %18 : vector<16x512xf32>
    %cst_9 = arith.constant 1.000000e+00 : f32
    %20 = vector.broadcast %cst_9 : f32 to vector<16x512xf32>
    %21 = arith.addf %20, %19 : vector<16x512xf32>
    %22 = arith.mulf %11, %21 : vector<16x512xf32>
    %c0_10 = arith.constant 0 : index
    %c0_11 = arith.constant 0 : index
    %23 = vector.load %arg8[%c0_10, %c0_11] : memref<16x128xf32, #tpu.memory_space<vmem>>, vector<16x128xf32>
    %24 = arith.truncf %22 : vector<16x512xf32> to vector<16x512xbf16>
    %c0_12 = arith.constant 0 : index
    %c0_13 = arith.constant 0 : index
    %25 = vector.load %arg5[%c0_12, %c0_13] : memref<512x128xbf16, #tpu.memory_space<vmem>>, vector<512x128xbf16>
    %cst_14 = arith.constant dense<0.000000e+00> : vector<16x128xf32>
    %26 = tpu.matmul %24, %25, %cst_14 {dimension_numbers = #tpu.dot_dimension_numbers<[1], [0], [0], [1], [0, 0, 1, 1], [], []>} : vector<16x512xbf16>, vector<512x128xbf16>, vector<16x128xf32> -> vector<16x128xf32>
    %27 = arith.addf %23, %26 : vector<16x128xf32>
    %c0_15 = arith.constant 0 : index
    %c0_16 = arith.constant 0 : index
    %28 = vector.load %arg8[%c0_15, %c0_16] : memref<16x128xf32, #tpu.memory_space<vmem>>, vector<16x128xf32>
    tpu.vector_store %arg8[%c0_15, %c0_16], %27 {strides = array<i32>} : memref<16x128xf32, #tpu.memory_space<vmem>>, vector<16x128xf32>,
    %c0_i32_17 = arith.constant 0 : i32
    %29 = arith.cmpi eq, %arg1, %c0_i32_17 : i32
    %30 = arith.extui %29 : i1 to i32
    %c0_i32_18 = arith.constant 0 : i32
    %31 = arith.cmpi ne, %30, %c0_i32_18 : i32
    scf.if %31 {
      %c0_19 = arith.constant 0 : index
      %c0_20 = arith.constant 0 : index
      %32 = vector.load %arg8[%c0_19, %c0_20] : memref<16x128xf32, #tpu.memory_space<vmem>>, vector<16x128xf32>
      %c0_21 = arith.constant 0 : index
      %c0_22 = arith.constant 0 : index
      %33 = vector.load %arg6[%c0_21, %c0_22] : memref<1x128xf32, #tpu.memory_space<vmem>>, vector<1x128xf32>
      %34 = vector.broadcast %33 : vector<1x128xf32> to vector<16x128xf32>
      %35 = arith.addf %32, %34 : vector<16x128xf32>
      %c0_23 = arith.constant 0 : index
      %c0_24 = arith.constant 0 : index
      %36 = vector.load %arg7[%c0_23, %c0_24] : memref<16x128xf32, #tpu.memory_space<vmem>>, vector<16x128xf32>
      tpu.vector_store %arg7[%c0_23, %c0_24], %35 {strides = array<i32>} : memref<16x128xf32, #tpu.memory_space<vmem>>, vector<16x128xf32>,
    } else {
    }
    return
  }
  func.func @transform_0(%arg0: i32, %arg1: i32) -> (i32, i32) {
    %c0_i32 = arith.constant 0 : i32
    %c0_i32_0 = arith.constant 0 : i32
    return %arg0, %c0_i32 : i32, i32
  }
  func.func @transform_1(%arg0: i32, %arg1: i32) -> (i32, i32) {
    %c0_i32 = arith.constant 0 : i32
    %c0_i32_0 = arith.constant 0 : i32
    return %c0_i32, %arg1 : i32, i32
  }
  func.func @transform_2(%arg0: i32, %arg1: i32) -> (i32, i32) {
    %c0_i32 = arith.constant 0 : i32
    %c0_i32_0 = arith.constant 0 : i32
    return %c0_i32, %arg1 : i32, i32
  }
  func.func @transform_3(%arg0: i32, %arg1: i32) -> (i32, i32) {
    %c0_i32 = arith.constant 0 : i32
    %c0_i32_0 = arith.constant 0 : i32
    return %arg1, %c0_i32 : i32, i32
  }
  func.func @transform_4(%arg0: i32, %arg1: i32) -> (i32, i32) {
    %c0_i32 = arith.constant 0 : i32
    %c0_i32_0 = arith.constant 0 : i32
    %c0_i32_1 = arith.constant 0 : i32
    return %c0_i32, %c0_i32_0 : i32, i32
  }
  func.func @transform_5(%arg0: i32, %arg1: i32) -> (i32, i32) {
    %c0_i32 = arith.constant 0 : i32
    %c0_i32_0 = arith.constant 0 : i32
    return %arg0, %c0_i32 : i32, i32
  }
}

module attributes {stable_mosaic.version = 11 : i64} {
  func.func @_layernorm_kernel(%arg0: i32, %arg1: memref<16x128xf32, #tpu.memory_space<vmem>>, %arg2: memref<1x128xf32, #tpu.memory_space<vmem>>, %arg3: memref<1x128xf32, #tpu.memory_space<vmem>>, %arg4: memref<16x128xf32, #tpu.memory_space<vmem>>) attributes {dimension_semantics = [#tpu.dimension_semantics<parallel>], iteration_bounds = array<i64: 1>, scalar_prefetch = 0 : i64, scratch_operands = 0 : i64, tpu.core_type = #tpu.core_type<tc>, window_params = [{transform_indices = @transform_0, window_bounds = array<i64: 16, 128>}, {pipeline_mode = #tpu.pipeline_mode<synchronous>, transform_indices = @transform_1, window_bounds = array<i64: 1, 128>}, {pipeline_mode = #tpu.pipeline_mode<synchronous>, transform_indices = @transform_2, window_bounds = array<i64: 1, 128>}, {transform_indices = @transform_3, window_bounds = array<i64: 16, 128>}]} {
    %c0 = arith.constant 0 : index
    %c0_0 = arith.constant 0 : index
    %0 = vector.load %arg1[%c0, %c0_0] : memref<16x128xf32, #tpu.memory_space<vmem>>, vector<16x128xf32>
    %c0_1 = arith.constant 0 : index
    %c0_2 = arith.constant 0 : index
    %1 = vector.load %arg2[%c0_1, %c0_2] : memref<1x128xf32, #tpu.memory_space<vmem>>, vector<1x128xf32>
    %c0_3 = arith.constant 0 : index
    %c0_4 = arith.constant 0 : index
    %2 = vector.load %arg3[%c0_3, %c0_4] : memref<1x128xf32, #tpu.memory_space<vmem>>, vector<1x128xf32>
    %cst = arith.constant dense<0.000000e+00> : vector<16xf32>
    %3 = vector.multi_reduction <add>, %0, %cst [1] : vector<16x128xf32> to vector<16xf32>
    %4 = vector.shape_cast %3 : vector<16xf32> to vector<16x1xf32>
    %cst_5 = arith.constant 1.280000e+02 : f32
    %5 = vector.broadcast %cst_5 : f32 to vector<16x1xf32>
    %6 = arith.divf %4, %5 : vector<16x1xf32>
    %7 = vector.broadcast %6 : vector<16x1xf32> to vector<16x128xf32>
    %8 = arith.subf %0, %7 : vector<16x128xf32>
    %9 = arith.mulf %8, %8 : vector<16x128xf32>
    %cst_6 = arith.constant dense<0.000000e+00> : vector<16xf32>
    %10 = vector.multi_reduction <add>, %9, %cst_6 [1] : vector<16x128xf32> to vector<16xf32>
    %11 = vector.shape_cast %10 : vector<16xf32> to vector<16x1xf32>
    %cst_7 = arith.constant 1.280000e+02 : f32
    %12 = vector.broadcast %cst_7 : f32 to vector<16x1xf32>
    %13 = arith.divf %11, %12 : vector<16x1xf32>
    %cst_8 = arith.constant 9.99999974E-6 : f32
    %14 = vector.broadcast %cst_8 : f32 to vector<16x1xf32>
    %15 = arith.addf %13, %14 : vector<16x1xf32>
    %16 = math.rsqrt %15 : vector<16x1xf32>
    %17 = vector.broadcast %16 : vector<16x1xf32> to vector<16x128xf32>
    %18 = arith.mulf %8, %17 : vector<16x128xf32>
    %19 = vector.broadcast %1 : vector<1x128xf32> to vector<16x128xf32>
    %20 = arith.mulf %18, %19 : vector<16x128xf32>
    %21 = vector.broadcast %2 : vector<1x128xf32> to vector<16x128xf32>
    %22 = arith.addf %20, %21 : vector<16x128xf32>
    %c0_9 = arith.constant 0 : index
    %c0_10 = arith.constant 0 : index
    %23 = vector.load %arg4[%c0_9, %c0_10] : memref<16x128xf32, #tpu.memory_space<vmem>>, vector<16x128xf32>
    tpu.vector_store %arg4[%c0_9, %c0_10], %22 {strides = array<i32>} : memref<16x128xf32, #tpu.memory_space<vmem>>, vector<16x128xf32>,
    return
  }
  func.func @transform_0(%arg0: i32) -> (i32, i32) {
    %c0_i32 = arith.constant 0 : i32
    %c0_i32_0 = arith.constant 0 : i32
    return %arg0, %c0_i32 : i32, i32
  }
  func.func @transform_1(%arg0: i32) -> (i32, i32) {
    %c0_i32 = arith.constant 0 : i32
    %c0_i32_0 = arith.constant 0 : i32
    %c0_i32_1 = arith.constant 0 : i32
    return %c0_i32, %c0_i32_0 : i32, i32
  }
  func.func @transform_2(%arg0: i32) -> (i32, i32) {
    %c0_i32 = arith.constant 0 : i32
    %c0_i32_0 = arith.constant 0 : i32
    %c0_i32_1 = arith.constant 0 : i32
    return %c0_i32, %c0_i32_0 : i32, i32
  }
  func.func @transform_3(%arg0: i32) -> (i32, i32) {
    %c0_i32 = arith.constant 0 : i32
    %c0_i32_0 = arith.constant 0 : i32
    return %arg0, %c0_i32 : i32, i32
  }
}

module attributes {stable_mosaic.version = 11 : i64} {
  func.func @_linear_kernel(%arg0: i32, %arg1: i32, %arg2: i32, %arg3: memref<16x128xf32, #tpu.memory_space<vmem>>, %arg4: memref<128x64xbf16, #tpu.memory_space<vmem>>, %arg5: memref<1x64xf32, #tpu.memory_space<vmem>>, %arg6: memref<16x64xf32, #tpu.memory_space<vmem>>, %arg7: memref<16x64xf32, #tpu.memory_space<vmem>>) attributes {dimension_semantics = [#tpu.dimension_semantics<parallel>, #tpu.dimension_semantics<parallel>, #tpu.dimension_semantics<arbitrary>], iteration_bounds = array<i64: 1, 1, 1>, scalar_prefetch = 0 : i64, scratch_operands = 1 : i64, tpu.core_type = #tpu.core_type<tc>, window_params = [{transform_indices = @transform_0, window_bounds = array<i64: 16, 128>}, {transform_indices = @transform_1, window_bounds = array<i64: 128, 64>}, {transform_indices = @transform_2, window_bounds = array<i64: 1, 64>}, {transform_indices = @transform_3, window_bounds = array<i64: 16, 64>}]} {
    %c0_i32 = arith.constant 0 : i32
    %0 = arith.cmpi eq, %arg2, %c0_i32 : i32
    %1 = arith.extui %0 : i1 to i32
    %c0_i32_0 = arith.constant 0 : i32
    %2 = arith.cmpi ne, %1, %c0_i32_0 : i32
    scf.if %2 {
      %cst_10 = arith.constant 0.000000e+00 : f32
      %13 = vector.broadcast %cst_10 : f32 to vector<16x64xf32>
      %c0_11 = arith.constant 0 : index
      %c0_12 = arith.constant 0 : index
      %14 = vector.load %arg7[%c0_11, %c0_12] : memref<16x64xf32, #tpu.memory_space<vmem>>, vector<16x64xf32>
      tpu.vector_store %arg7[%c0_11, %c0_12], %13 {strides = array<i32>} : memref<16x64xf32, #tpu.memory_space<vmem>>, vector<16x64xf32>,
    } else {
    }
    %c0 = arith.constant 0 : index
    %c0_1 = arith.constant 0 : index
    %3 = vector.load %arg7[%c0, %c0_1] : memref<16x64xf32, #tpu.memory_space<vmem>>, vector<16x64xf32>
    %c0_2 = arith.constant 0 : index
    %c0_3 = arith.constant 0 : index
    %4 = vector.load %arg3[%c0_2, %c0_3] : memref<16x128xf32, #tpu.memory_space<vmem>>, vector<16x128xf32>
    %5 = arith.truncf %4 : vector<16x128xf32> to vector<16x128xbf16>
    %c0_4 = arith.constant 0 : index
    %c0_5 = arith.constant 0 : index
    %6 = vector.load %arg4[%c0_4, %c0_5] : memref<128x64xbf16, #tpu.memory_space<vmem>>, vector<128x64xbf16>
    %cst = arith.constant dense<0.000000e+00> : vector<16x64xf32>
    %7 = tpu.matmul %5, %6, %cst {dimension_numbers = #tpu.dot_dimension_numbers<[1], [0], [0], [1], [0, 0, 1, 1], [], []>} : vector<16x128xbf16>, vector<128x64xbf16>, vector<16x64xf32> -> vector<16x64xf32>
    %8 = arith.addf %3, %7 : vector<16x64xf32>
    %c0_6 = arith.constant 0 : index
    %c0_7 = arith.constant 0 : index
    %9 = vector.load %arg7[%c0_6, %c0_7] : memref<16x64xf32, #tpu.memory_space<vmem>>, vector<16x64xf32>
    tpu.vector_store %arg7[%c0_6, %c0_7], %8 {strides = array<i32>} : memref<16x64xf32, #tpu.memory_space<vmem>>, vector<16x64xf32>,
    %c0_i32_8 = arith.constant 0 : i32
    %10 = arith.cmpi eq, %arg2, %c0_i32_8 : i32
    %11 = arith.extui %10 : i1 to i32
    %c0_i32_9 = arith.constant 0 : i32
    %12 = arith.cmpi ne, %11, %c0_i32_9 : i32
    scf.if %12 {
      %c0_10 = arith.constant 0 : index
      %c0_11 = arith.constant 0 : index
      %13 = vector.load %arg7[%c0_10, %c0_11] : memref<16x64xf32, #tpu.memory_space<vmem>>, vector<16x64xf32>
      %c0_12 = arith.constant 0 : index
      %c0_13 = arith.constant 0 : index
      %14 = vector.load %arg5[%c0_12, %c0_13] : memref<1x64xf32, #tpu.memory_space<vmem>>, vector<1x64xf32>
      %15 = vector.broadcast %14 : vector<1x64xf32> to vector<16x64xf32>
      %16 = arith.addf %13, %15 : vector<16x64xf32>
      %c0_14 = arith.constant 0 : index
      %c0_15 = arith.constant 0 : index
      %17 = vector.load %arg6[%c0_14, %c0_15] : memref<16x64xf32, #tpu.memory_space<vmem>>, vector<16x64xf32>
      tpu.vector_store %arg6[%c0_14, %c0_15], %16 {strides = array<i32>} : memref<16x64xf32, #tpu.memory_space<vmem>>, vector<16x64xf32>,
    } else {
    }
    return
  }
  func.func @transform_0(%arg0: i32, %arg1: i32, %arg2: i32) -> (i32, i32) {
    %c0_i32 = arith.constant 0 : i32
    return %arg0, %arg2 : i32, i32
  }
  func.func @transform_1(%arg0: i32, %arg1: i32, %arg2: i32) -> (i32, i32) {
    %c0_i32 = arith.constant 0 : i32
    return %arg2, %arg1 : i32, i32
  }
  func.func @transform_2(%arg0: i32, %arg1: i32, %arg2: i32) -> (i32, i32) {
    %c0_i32 = arith.constant 0 : i32
    %c0_i32_0 = arith.constant 0 : i32
    return %c0_i32, %arg1 : i32, i32
  }
  func.func @transform_3(%arg0: i32, %arg1: i32, %arg2: i32) -> (i32, i32) {
    %c0_i32 = arith.constant 0 : i32
    return %arg0, %arg1 : i32, i32
  }
}

</mosaic_0001>

<bundles_post_ra>
// kernel: forward.17
= control target key start
LH: loop header
LB: loop body
LE: loop exit
PB: predicated region body
PF: predicated region fallthrough
CT: control target
= control target key end

     0   :  { %s125_s0 = inlined_call_operand.vmem [shape: f32[16,128], index: 0, kind: input, shape index: {}]   ;;  %s126_s1 = inlined_call_operand.vmem [shape: f32[16,128], index: 1, kind: input, shape index: {}]   ;;  %s127_s2 = inlined_call_operand.vmem [shape: f32[1,128], index: 2, kind: input, shape index: {}]   ;;  %s128_s3 = inlined_call_operand.vmem [shape: f32[1,128], index: 3, kind: input, shape index: {}]   ;;  %s129_s4 = inlined_call_operand.vmem [shape: f32[16,128], index: 4, kind: output, shape index: {}]  }
   0x1   :  { %v17_v0 = vld [vmem:[%s125_s0] sm:$0xff]  ;;  %v18_v2 = vld [vmem:[%s125_s0 + $0x8] sm:$0xff] }
   0x2   :  { %v19_v1 = vld [vmem:[%s126_s1] sm:$0xff]  ;;  %v20_v4 = vld [vmem:[%s126_s1 + $0x8] sm:$0xff] }
   0x3   :  { %v21_v3 = vadd.f32 %v19_v1, %v17_v0  ;;  %v22_v5 = vadd.f32 %v20_v4, %v18_v2  ;;  %v70_v21 = vld [vmem:[%s127_s2] ss:$0 sm:$0xff] }
   0x4   :  { %v71_v23 = vld [vmem:[%s128_s3] ss:$0 sm:$0xff] }
   0x5   :  { %25 = vadd.xlane.f32.xlu0 %v21_v3 }
   0x9   :  { %27 = vadd.xlane.f32.xlu0 %v22_v5 }
  0x92   :  { %v26_v6 = vpop.xlane.xlu0 %25 }
  0x93   :  { %v30_v7 = vmul.f32 0.0078125, %v26_v6 }
  0x95   :  { %v32_v8 = vsub.f32 %v21_v3, %v30_v7 }
  0x96   :  { %v28_v9 = vpop.xlane.xlu0 %27 }
  0x97   :  { %v31_v10 = vmul.f32 0.0078125, %v28_v9  ;;  %v34_v11 = vmul.f32 %v32_v8, %v32_v8 }
  0x99   :  { %v33_v12 = vsub.f32 %v22_v5, %v31_v10  ;;  %36 = vadd.xlane.f32.xlu1 %v34_v11 }
  0x9b   :  { %v35_v13 = vmul.f32 %v33_v12, %v33_v12 }
  0x9d   :  { %38 = vadd.xlane.f32.xlu1 %v35_v13 }
 0x126   :  { %v37_v14 = vpop.xlane.xlu1 %36 }
 0x127   :  { %v40_v15 = vmul.f32 0.0078125, %v37_v14 }
 0x129   :  { %v42_v16 = vadd.f32 1e-05, %v40_v15 }
 0x12a   :  { %v39_v17 = vpop.xlane.xlu1 %38 }
 0x12b   :  { %72 = vrsqrt.f32 %v42_v16  ;;  %v41_v18 = vmul.f32 0.0078125, %v39_v17 }
 0x12d   :  { %v43_v19 = vadd.f32 1e-05, %v41_v18 }
 0x12f   :  { %74 = vrsqrt.f32 %v43_v19 }
 0x135   :  { %v73_v20 = vpop.eup %72 }
 0x136   :  { %v46_v22 = vmul.f32 %v73_v20, %v32_v8 }
 0x138   :  { %v54_v24 = vmul.f32 %v70_v21, %v46_v22 }
 0x139   :  { %v75_v25 = vpop.eup %74 }
 0x13a   :  { %v62_v26 = vadd.f32 %v71_v23, %v54_v24  ;;  %v47_v27 = vmul.f32 %v75_v25, %v33_v12 }
 0x13c   :  { %64 = vst [vmem:[%s129_s4] sm:$0xff] %v62_v26  ;;  %v55_v28 = vmul.f32 %v70_v21, %v47_v27 }
 0x13e   :  { %v63_v29 = vadd.f32 %v71_v23, %v55_v28 }
 0x140   :  { %65 = vst [vmem:[%s129_s4 + $0x8] sm:$0xff] %v63_v29 }

// kernel: forward.15
= control target key start
LH: loop header
LB: loop body
LE: loop exit
PB: predicated region body
PF: predicated region fallthrough
CT: control target
= control target key end

     0   :  { %v263_v1 = vmov 0   ;;  %v186_v20 = vlaneseq  ;;  %s347_s1 = inlined_call_operand.vmem [shape: bf16[128,256], index: 1, kind: input, shape index: {}]   ;;  %s348_s0 = inlined_call_operand.vmem [shape: f32[16,128], index: 0, kind: input, shape index: {}]   ;;  %s349_s2 = inlined_call_operand.vmem [shape: f32[1,256], index: 2, kind: input, shape index: {}]   ;;  %s350_s3 = inlined_call_operand.vmem [shape: bf16[16,256], index: 3, kind: output, shape index: {}]  }
   0x1   :  { %v239_v0 = vld [vmem:[%s347_s1 + $0x4] ss:$8 sps:$4 sm:$0xff]   ;;  %158 = vmatprep.mubr.bf16.mxu0 %v263_v1  ;;  %v241_v2 = vld [vmem:[%s347_s1] ss:$8 sps:$4 sm:$0xff]   ;;  %v242_v3 = vld [vmem:[%s347_s1 + $0x14] ss:$8 sps:$4 sm:$0xff]  }
   0x2   :  { %126 = vmatprep.subr.bf16.mxu0 %v239_v0  ;;  %v244_v4 = vld [vmem:[%s347_s1 + $0x10] ss:$8 sps:$4 sm:$0xff]   ;;  %v245_v5 = vld [vmem:[%s347_s1 + $0x24] ss:$8 sps:$4 sm:$0xff]   ;;  %v247_v6 = vld [vmem:[%s347_s1 + $0x20] ss:$8 sps:$4 sm:$0xff]  }
   0x3   :  { %127 = vmatpush1.bf16.msra.mxu0 %v241_v2  ;;  %v248_v7 = vld [vmem:[%s347_s1 + $0x34] ss:$8 sps:$4 sm:$0xff]   ;;  %v250_v8 = vld [vmem:[%s347_s1 + $0x30] ss:$8 sps:$4 sm:$0xff]   ;;  %v251_v9 = vld [vmem:[%s347_s1 + $0x44] ss:$8 sps:$4 sm:$0xff]  }
   0x4   :  { %128 = vmatprep.subr.bf16.mxu0 %v242_v3  ;;  %v253_v10 = vld [vmem:[%s347_s1 + $0x40] ss:$8 sps:$4 sm:$0xff]   ;;  %v254_v11 = vld [vmem:[%s347_s1 + $0x54] ss:$8 sps:$4 sm:$0xff]   ;;  %v256_v12 = vld [vmem:[%s347_s1 + $0x50] ss:$8 sps:$4 sm:$0xff]  }
   0x5   :  { %v257_v13 = vld [vmem:[%s347_s1 + $0x64] ss:$8 sps:$4 sm:$0xff]   ;;  %v259_v14 = vld [vmem:[%s347_s1 + $0x60] ss:$8 sps:$4 sm:$0xff]   ;;  %v260_v15 = vld [vmem:[%s347_s1 + $0x74] ss:$8 sps:$4 sm:$0xff]  }
   0x6   :  { %v262_v16 = vld [vmem:[%s347_s1 + $0x70] ss:$8 sps:$4 sm:$0xff]   ;;  %v27_v17 = vld [vmem:[%s348_s0] sm:$0xff]  ;;  %v28_v18 = vld [vmem:[%s348_s0 + $0x8] sm:$0xff]  ;;  %v187_v21 = vshrl.u32 %v186_v20, 7 }
   0x7   :  { %129 = vmatpush1.bf16.msra.mxu0 %v244_v4  ;;  %v29_v19 = vpack.c.bf16 %v28_v18, %v27_v17  ;;  %v184_v23 = vld [vmem:[%s349_s2] sm:$0x3] }
   0x8   :  { %130 = vmatprep.subr.bf16.mxu0 %v245_v5  ;;  %v188_v22 = vsub.s32 0, %v187_v21  ;;  %v192_v24 = vsub.s32 1, %v187_v21 }
   0xa   :  { %v189_v25 = vrot.slane %v184_v23, %v188_v22  ;;  %v193_v26 = vrot.slane %v184_v23, %v192_v24 }
   0xb   :  { %131 = vmatpush1.bf16.msra.mxu0 %v247_v6 }
   0xc   :  { %132 = vmatprep.subr.bf16.mxu0 %v248_v7 }
   0xf   :  { %133 = vmatpush1.bf16.msra.mxu0 %v250_v8 }
  0x10   :  { %134 = vmatprep.subr.bf16.mxu0 %v251_v9 }
  0x13   :  { %135 = vmatpush1.bf16.msra.mxu0 %v253_v10 }
  0x14   :  { %136 = vmatprep.subr.bf16.mxu0 %v254_v11 }
  0x17   :  { %137 = vmatpush1.bf16.msra.mxu0 %v256_v12 }
  0x18   :  { %138 = vmatprep.subr.bf16.mxu0 %v257_v13 }
  0x1b   :  { %139 = vmatpush1.bf16.msra.mxu0 %v259_v14 }
  0x1c   :  { %140 = vmatprep.subr.bf16.mxu0 %v260_v15 }
  0x1f   :  { %141 = vmatpush1.bf16.msra.mxu0 %v262_v16 }
  0x22   :  { %159 = vmatmul.mubr.bf16.vlgmr.msra.gmra.mrb[0].mxu0 %v29_v19 }
  0xf5   :  { %v160_v27 = vpop.f32.mrb[0].mxu0 }
  0xf6   :  { %v196_v28 = vadd.f32 %v189_v25, %v160_v27  ;;  %v162_v29 = vpop.f32.mrb[1].mxu0 }
  0xf7   :  { %v197_v30 = vadd.f32 %v193_v26, %v162_v29  ;;  %v164_v31 = vpop.f32.mrb[2].mxu0 }
  0xf8   :  { %v198_v32 = vadd.f32 %v189_v25, %v164_v31  ;;  %v166_v33 = vpop.f32.mrb[3].mxu0 }
  0xf9   :  { %v236_v34 = vpack.c.bf16 %v197_v30, %v196_v28  ;;  %v199_v35 = vadd.f32 %v193_v26, %v166_v33 }
  0xfb   :  { %212 = vst [vmem:[%s350_s3] sm:$0xff] %v236_v34  ;;  %v237_v36 = vpack.c.bf16 %v199_v35, %v198_v32 }
  0xfd   :  { %213 = vst [vmem:[%s350_s3 + $0x8] sm:$0xff] %v237_v36 }

// kernel: forward.14
= control target key start
LH: loop header
LB: loop body
LE: loop exit
PB: predicated region body
PF: predicated region fallthrough
CT: control target
= control target key end

     0   :  { %v494_v1 = vmov 0   ;;  %v345_v36 = vlaneseq  ;;  %s632_s1 = inlined_call_operand.vmem [shape: bf16[128,512], index: 1, kind: input, shape index: {}]   ;;  %s633_s0 = inlined_call_operand.vmem [shape: f32[16,128], index: 0, kind: input, shape index: {}]   ;;  %s634_s2 = inlined_call_operand.vmem [shape: f32[1,512], index: 2, kind: input, shape index: {}]   ;;  %s635_s3 = inlined_call_operand.vmem [shape: bf16[16,512], index: 3, kind: output, shape index: {}]  }
   0x1   :  { %v446_v0 = vld [vmem:[%s632_s1 + $0x4] ss:$16 sps:$4 sm:$0xff]   ;;  %262 = vmatprep.mubr.bf16.mxu0 %v494_v1  ;;  %305 = vmatprep.mubr.bf16.mxu1 %v494_v1  ;;  %v448_v2 = vld [vmem:[%s632_s1 + $0xc] ss:$16 sps:$4 sm:$0xff]   ;;  %v450_v3 = vld [vmem:[%s632_s1] ss:$16 sps:$4 sm:$0xff]  }
   0x2   :  { %230 = vmatprep.subr.bf16.mxu0 %v446_v0  ;;  %v451_v4 = vld [vmem:[%s632_s1 + $0x8] ss:$16 sps:$4 sm:$0xff]   ;;  %273 = vmatprep.subr.bf16.mxu1 %v448_v2  ;;  %v452_v5 = vld [vmem:[%s632_s1 + $0x24] ss:$16 sps:$4 sm:$0xff]   ;;  %v454_v6 = vld [vmem:[%s632_s1 + $0x2c] ss:$16 sps:$4 sm:$0xff]  }
   0x3   :  { %231 = vmatpush1.bf16.msra.mxu0 %v450_v3  ;;  %274 = vmatpush1.bf16.msra.mxu1 %v451_v4  ;;  %v456_v7 = vld [vmem:[%s632_s1 + $0x20] ss:$16 sps:$4 sm:$0xff]   ;;  %v457_v8 = vld [vmem:[%s632_s1 + $0x28] ss:$16 sps:$4 sm:$0xff]   ;;  %v458_v9 = vld [vmem:[%s632_s1 + $0x44] ss:$16 sps:$4 sm:$0xff]  }
   0x4   :  { %232 = vmatprep.subr.bf16.mxu0 %v452_v5  ;;  %275 = vmatprep.subr.bf16.mxu1 %v454_v6  ;;  %v460_v10 = vld [vmem:[%s632_s1 + $0x4c] ss:$16 sps:$4 sm:$0xff]   ;;  %v462_v11 = vld [vmem:[%s632_s1 + $0x40] ss:$16 sps:$4 sm:$0xff]   ;;  %v463_v12 = vld [vmem:[%s632_s1 + $0x48] ss:$16 sps:$4 sm:$0xff]  }
   0x5   :  { %v464_v13 = vld [vmem:[%s632_s1 + $0x64] ss:$16 sps:$4 sm:$0xff]   ;;  %v466_v14 = vld [vmem:[%s632_s1 + $0x6c] ss:$16 sps:$4 sm:$0xff]   ;;  %v468_v15 = vld [vmem:[%s632_s1 + $0x60] ss:$16 sps:$4 sm:$0xff]  }
   0x6   :  { %v469_v16 = vld [vmem:[%s632_s1 + $0x68] ss:$16 sps:$4 sm:$0xff]   ;;  %v470_v17 = vld [vmem:[%s632_s1 + $0x84] ss:$16 sps:$4 sm:$0xff]   ;;  %v472_v18 = vld [vmem:[%s632_s1 + $0x8c] ss:$16 sps:$4 sm:$0xff]  }
   0x7   :  { %233 = vmatpush1.bf16.msra.mxu0 %v456_v7  ;;  %276 = vmatpush1.bf16.msra.mxu1 %v457_v8  ;;  %v474_v19 = vld [vmem:[%s632_s1 + $0x80] ss:$16 sps:$4 sm:$0xff]   ;;  %v475_v20 = vld [vmem:[%s632_s1 + $0x88] ss:$16 sps:$4 sm:$0xff]   ;;  %v476_v21 = vld [vmem:[%s632_s1 + $0xa4] ss:$16 sps:$4 sm:$0xff]  }
   0x8   :  { %234 = vmatprep.subr.bf16.mxu0 %v458_v9  ;;  %277 = vmatprep.subr.bf16.mxu1 %v460_v10  ;;  %v478_v22 = vld [vmem:[%s632_s1 + $0xac] ss:$16 sps:$4 sm:$0xff]   ;;  %v480_v23 = vld [vmem:[%s632_s1 + $0xa0] ss:$16 sps:$4 sm:$0xff]   ;;  %v481_v24 = vld [vmem:[%s632_s1 + $0xa8] ss:$16 sps:$4 sm:$0xff]  }
   0x9   :  { %v482_v25 = vld [vmem:[%s632_s1 + $0xc4] ss:$16 sps:$4 sm:$0xff]   ;;  %v484_v26 = vld [vmem:[%s632_s1 + $0xcc] ss:$16 sps:$4 sm:$0xff]   ;;  %v486_v27 = vld [vmem:[%s632_s1 + $0xc0] ss:$16 sps:$4 sm:$0xff]  }
   0xa   :  { %v487_v28 = vld [vmem:[%s632_s1 + $0xc8] ss:$16 sps:$4 sm:$0xff]   ;;  %v488_v29 = vld [vmem:[%s632_s1 + $0xe4] ss:$16 sps:$4 sm:$0xff]   ;;  %v490_v30 = vld [vmem:[%s632_s1 + $0xec] ss:$16 sps:$4 sm:$0xff]  }
   0xb   :  { %235 = vmatpush1.bf16.msra.mxu0 %v462_v11  ;;  %278 = vmatpush1.bf16.msra.mxu1 %v463_v12  ;;  %v492_v31 = vld [vmem:[%s632_s1 + $0xe0] ss:$16 sps:$4 sm:$0xff]   ;;  %v493_v32 = vld [vmem:[%s632_s1 + $0xe8] ss:$16 sps:$4 sm:$0xff]   ;;  %v346_v37 = vshrl.u32 %v345_v36, 7 }
   0xc   :  { %236 = vmatprep.subr.bf16.mxu0 %v464_v13  ;;  %279 = vmatprep.subr.bf16.mxu1 %v466_v14  ;;  %v35_v33 = vld [vmem:[%s633_s0] sm:$0xff]  ;;  %v36_v34 = vld [vmem:[%s633_s0 + $0x8] sm:$0xff] }
   0xd   :  { %v37_v35 = vpack.c.bf16 %v36_v34, %v35_v33  ;;  %v347_v38 = vsub.s32 0, %v346_v37  ;;  %v355_v39 = vsub.s32 2, %v346_v37  ;;  %v343_v40 = vld [vmem:[%s634_s2] sm:$0xf]  ;;  %v351_v41 = vsub.s32 1, %v346_v37 }
   0xe   :  { %v359_v42 = vsub.s32 3, %v346_v37 }
   0xf   :  { %237 = vmatpush1.bf16.msra.mxu0 %v468_v15  ;;  %280 = vmatpush1.bf16.msra.mxu1 %v469_v16  ;;  %v348_v43 = vrot.slane %v343_v40, %v347_v38  ;;  %v356_v44 = vrot.slane %v343_v40, %v355_v39  ;;  %v352_v45 = vrot.slane %v343_v40, %v351_v41 }
  0x10   :  { %238 = vmatprep.subr.bf16.mxu0 %v470_v17  ;;  %281 = vmatprep.subr.bf16.mxu1 %v472_v18  ;;  %v360_v46 = vrot.slane %v343_v40, %v359_v42 }
  0x13   :  { %239 = vmatpush1.bf16.msra.mxu0 %v474_v19  ;;  %282 = vmatpush1.bf16.msra.mxu1 %v475_v20 }
  0x14   :  { %240 = vmatprep.subr.bf16.mxu0 %v476_v21  ;;  %283 = vmatprep.subr.bf16.mxu1 %v478_v22 }
  0x17   :  { %241 = vmatpush1.bf16.msra.mxu0 %v480_v23  ;;  %284 = vmatpush1.bf16.msra.mxu1 %v481_v24 }
  0x18   :  { %242 = vmatprep.subr.bf16.mxu0 %v482_v25  ;;  %285 = vmatprep.subr.bf16.mxu1 %v484_v26 }
  0x1b   :  { %243 = vmatpush1.bf16.msra.mxu0 %v486_v27  ;;  %286 = vmatpush1.bf16.msra.mxu1 %v487_v28 }
  0x1c   :  { %244 = vmatprep.subr.bf16.mxu0 %v488_v29  ;;  %287 = vmatprep.subr.bf16.mxu1 %v490_v30 }
  0x1f   :  { %245 = vmatpush1.bf16.msra.mxu0 %v492_v31  ;;  %288 = vmatpush1.bf16.msra.mxu1 %v493_v32 }
  0x22   :  { %263 = vmatmul.mubr.bf16.vlgmr.msra.gmra.mrb[0].mxu0 %v37_v35  ;;  %306 = vmatmul.mubr.bf16.vlgmr.msra.gmra.mrb[0].mxu1 %v37_v35 }
  0xf5   :  { %v264_v47 = vpop.f32.mrb[0].mxu0  ;;  %v307_v48 = vpop.f32.mrb[0].mxu1 }
  0xf6   :  { %v365_v49 = vadd.f32 %v348_v43, %v264_v47  ;;  %v367_v50 = vadd.f32 %v356_v44, %v307_v48  ;;  %v266_v51 = vpop.f32.mrb[1].mxu0  ;;  %v309_v52 = vpop.f32.mrb[1].mxu1 }
  0xf7   :  { %v366_v53 = vadd.f32 %v352_v45, %v266_v51  ;;  %v368_v54 = vadd.f32 %v360_v46, %v309_v52  ;;  %v268_v55 = vpop.f32.mrb[2].mxu0  ;;  %v311_v56 = vpop.f32.mrb[2].mxu1 }
  0xf8   :  { %v369_v57 = vadd.f32 %v348_v43, %v268_v55  ;;  %v371_v58 = vadd.f32 %v356_v44, %v311_v56  ;;  %v270_v59 = vpop.f32.mrb[3].mxu0  ;;  %v313_v60 = vpop.f32.mrb[3].mxu1 }
  0xf9   :  { %v441_v61 = vpack.c.bf16 %v366_v53, %v365_v49  ;;  %v442_v62 = vpack.c.bf16 %v368_v54, %v367_v50  ;;  %v370_v63 = vadd.f32 %v352_v45, %v270_v59  ;;  %v372_v0 = vadd.f32 %v360_v46, %v313_v60 }
  0xfb   :  { %397 = vst [vmem:[%s635_s3] sm:$0xff] %v441_v61  ;;  %398 = vst [vmem:[%s635_s3 + $0x8] sm:$0xff] %v442_v62  ;;  %v443_v1 = vpack.c.bf16 %v370_v63, %v369_v57  ;;  %v444_v2 = vpack.c.bf16 %v372_v0, %v371_v58 }
  0xfd   :  { %399 = vst [vmem:[%s635_s3 + $0x10] sm:$0xff] %v443_v1  ;;  %400 = vst [vmem:[%s635_s3 + $0x18] sm:$0xff] %v444_v2 }

// kernel: forward.16
= control target key start
LH: loop header
LB: loop body
LE: loop exit
PB: predicated region body
PF: predicated region fallthrough
CT: control target
= control target key end

     0   :  { %10 = vsyncpa [#allocation9], 0  ;;  %s1114_s18 = smov 0   ;;  %s1116_s19 = smov 0   ;;  %s1240_s0 = inlined_call_operand.vmem [shape: f32[2], index: 0, kind: input, shape index: {}]   ;;  %s1241_s1 = inlined_call_operand.vmem [shape: bf16[2,8,512], index: 1, kind: input, shape index: {}, may-alias: {1,2}]   ;;  %s1242_s2 = inlined_call_operand.vmem [shape: bf16[2,8,512], index: 2, kind: input, shape index: {}, may-alias: {1,2}]   ;;  %s1243_s3 = inlined_call_operand.vmem [shape: bf16[2,8,256], index: 3, kind: input, shape index: {}]   ;;  %s1244_s4 = inlined_call_operand.vmem [shape: f32[1,128], index: 4, kind: input, shape index: {}]   ;;  %s1245_s5 = inlined_call_operand.vmem [shape: f32[2,8,128], index: 5, kind: output, shape index: {}]  }
   0x1   :  { %s1118_s20 = smov 0   ;;  %s1120_s21 = smov 0  }
   0x2   :  { %s1122_s22 = smov 0  }
   0x3 LB: > { %s885_s23 = sadd.s32 4294967295, %s1076_s22   ;;  %s34_s24 = sadd.s32 1, %s1068_s20  ;;  %s1076_s22 = sphi %s1122_s22, %s16_s22   ;;  %s1072_s21 = sphi %s1120_s21, %s1251_s21   ;;  %s1068_s20 = sphi %s1118_s20, %s1250_s20   ;;  %s1064_s19 = sphi %s1116_s19, %s1249_s19   ;;  %s1060_s18 = sphi %s1114_s18, %s1248_s18  }
   0x4   : > { %p36_p0 = scmp.ge.s32.totalorder %s34_s24, 2  ;;  %s42_s25 = sadd.s32 1, %s1072_s21 }
   0x5   : > { %p891_p1 = scmp.ge.s32.totalorder %s1076_s22, 1  ;;  %p213_p2 = scmp.lt.s32.totalorder %s1076_s22, 5 }
   0x6   : > { %s1253_s24 = smov (%p36_p0, %s34_s24), 0  ;;  %s1255_s25 = smov (!%p36_p0, %s42_s25), %s1072_s21 }
   0x7   : > { %p1147_p3 = pnand %p891_p1, %p213_p2  ;;  %p44_p4 = scmp.ge.s32.totalorder %s1255_s25, 2 }
   0x8   : > { %p1151_p5 = scmp.eq.s32.totalorder %s885_s23, 0  ;;  %s226_s30 = sshll.u32 %s1240_s0, 4  ;;  %s227_s30 = int_to_ptr.vmem [resolvable:$true] %s226_s30 }
   0x9   : > { %p952_p6 = pneg %p1147_p3  ;;  %s1257_s25 = smov (%p44_p4, %s1255_s25), 0 }
   0xa   : > { %s1019_s6 = scalar_lea.vmem %s227_s30, 16  ;;  %p1027_p12 = scmp.lt.s32.totalorder %s227_s30, %s227_s30 }
   0xb   : > { %p953_p7 = pnand %p1151_p5, %p952_p6  ;;  %p1020_p8 = scmp.ne.s32.totalorder %s227_s30, %s1019_s6 }
   0xc   : > { %p1028_p13 = scmp.lt.s32.totalorder %s1019_s6, %s1019_s6 }
   0xd   : > { %p1021_p9 = pneg %p953_p7 }
   0xe   : > { %p1029_p0 = por %p1028_p13, %p1027_p12 }
   0xf   : > { %p1022_p10 = pnand %p1021_p9, %p1020_p8 }
  0x11   : > { %p1023_p11 = pneg %p1022_p10 }
  0x13   : > { %p1030_p1 = pnand %p1029_p0, %p1023_p11 }
  0x15   : > { %1033 = shalt.err (!%p1030_p1)
}
  0x16   : > { %s1078_s7 = smov [#allocation8]   ;;  %293 = sbr.rel (%p1147_p3) target bundleno = 979 (0x3d3), region = 40 }
  0x17   : > { %955 = dma.vmem_to_smem (!%p953_p7), %s227_s30, 16, %s1078_s7, [#allocation9]  }
  0x1d   : > { %1055 = dma.done.wait (%p1151_p5), [#allocation9], 16  }
  0x1e   : > { %1057 = vsyncadd (%p1151_p5), [#allocation9], 4294967280 }
  0x1f   : > { %299 = sfence }
  0x20   : > { %s896_s8 = sshll.u32 %s1060_s18, 1  ;;  %p359_p2 = scmp.lt.s32.totalorder %s1064_s19, 1  ;;  %v1079_v0 = vmov 0.0   ;;  %vm1080_vm0 = vmmov 0   ;;  %vm424_vm1 = vcmask 523264   ;;  %vm413_vm2 = vcmask 7168  }
  0x21   : > { %s373_s9 = sadd.s32 1, %s896_s8  ;;  %930 = vmatprep.subr.bf16.mxu1 %v1079_v0  ;;  %924 = vmatprep.subr.bf16.mxu0 %v1079_v0  ;;  %p363_p4 = scmp.lt.s32.totalorder %s896_s8, 3  ;;  %v1082_v10 = vmov -inf   ;;  %416 = vst.msk [vmem:[#allocation3] sm:$0xff] %vm413_vm2, %v1079_v0  ;;  %417 = vst.msk [vmem:[#allocation5] sm:$0xff] %vm413_vm2, %v1079_v0  ;;  %vm528_vm3 = vcmask 64512  }
  0x22   : > { %s1259_s19 = smov (!%p359_p2, %s1064_s19), 1  ;;  %932 = vmatprep.mubr.msk.bf16.mxu1 %vm1080_vm0, %v1079_v0  ;;  %926 = vmatprep.mubr.msk.bf16.mxu0 %vm1080_vm0, %v1079_v0  ;;  %p378_p3 = scmp.lt.s32.totalorder %s373_s9, 3  ;;  %415 = vst.msk [vmem:[#allocation4] sm:$0xff] %vm413_vm2, %v1082_v10  ;;  %414 = vst.msk [vmem:[#allocation2] sm:$0xff] %vm413_vm2, %v1082_v10  ;;  %v1083_v21 = vmov 0   ;;  %vm563_vm4 = vcmask 1043456  }
  0x23   : > { %s897_s10 = sshll.u32 %s1259_s19, 2  ;;  %s904_s11 = sshll.u32 %s1259_s19, 3  ;;  %1004 = vset.pattern.permute.xlu0 %v1083_v21  ;;  %1005 = vset.pattern.permute.xlu1 %v1083_v21 }
  0x24   : > { %s1261_s9 = smov (!%p378_p3, %s373_s9), 3  ;;  %s1182_s14 = scalar_lea.vmem %s1245_s5, %s904_s11 }
  0x25   : > { %s383_s15 = sadd.s32 %s897_s10, %s1261_s9  ;;  %s1263_s8 = smov (!%p363_p4, %s896_s8), 3 }
  0x26   : > { %s901_s16 = sshll.u32 %s383_s15, 2  ;;  %s368_s27 = sadd.s32 %s897_s10, %s1263_s8 }
  0x27   : > { %s385_s26 = scalar_lea.vmem %s1242_s2, %s901_s16  ;;  %s1081_s28 = smov 64  }
  0x28   : > { %v421_v1 = vld [vmem:[%s385_s26] sm:$0xf]  ;;  %s898_s29 = sshll.u32 %s368_s27, 2  ;;  %p392_p5 = scmp.lt.s32.totalorder %s1060_s18, 1  ;;  %v626_v48 = vld [vmem:[#allocation5] sm:$0xff]  ;;  %v544_v51 = vld [vmem:[#allocation3] sm:$0xff] }
  0x29   : > { %v907_v2 = vcombine.low %v421_v1, %v421_v1  ;;  %v429_v3 = vsel %vm424_vm1, %v421_v1, 0  ;;  %s370_s7 = scalar_lea.vmem %s1241_s1, %s898_s29  ;;  %v610_v22 = vld [vmem:[#allocation4] sm:$0xff]  ;;  %v527_v25 = vld [vmem:[#allocation2] sm:$0xff]  ;;  %s902_s9 = sshll.u32 %s1259_s19, 1 }
  0x2a   : > { %925 = vmatpush3.bf16.xpose.msra.mxu0 %v429_v3  ;;  %v420_v4 = vld [vmem:[%s370_s7] sm:$0xf]  ;;  %s393_s8 = scalar_select %p392_p5, %s1060_s18, 1 }
  0x2b   : > { %479 = vrot.lane.b32.xlu0 %v907_v2, %s1081_s28  ;;  %936 = vmatprep.subr.bf16.mxu0 %v1079_v0  ;;  %v423_v5 = vmul.bf16 1040203264, %v420_v4  ;;  %s690_s19 = sld [smem:[#allocation8 + %s1060_s18]]  ;;  %p911_p6 = scmp.ne.s32.totalorder %s1060_s18, 0 }
  0x2c   : > { %s397_s10 = sadd.s32 %s902_s9, %s393_s8 }
  0x2d   : > { %v906_v6 = vcombine.low %v423_v5, %v423_v5  ;;  %s903_s11 = sshll.u32 %s397_s10, 2 }
  0x2e   : > { %s399_s15 = scalar_lea.vmem %s1243_s3, %s903_s11 }
  0x2f   : > { %474 = vrot.lane.b32.xlu0 %v906_v6, %s1081_s28  ;;  %v422_v30 = vld [vmem:[%s399_s15] sm:$0xf] }
  0x30   : > { %v565_v31 = vsel %vm563_vm4, %v422_v30, 0 }
  0x31   : > { %927 = vmatmul.mubr.msk.bf16.vlgmr.msra.gmra.mrb[0].mxu0 %vm424_vm1, %v423_v5  ;;  %v709_v10 = vstv %s690_s19 }
  0x32   : > { %938 = vmatprep.mubr.msk.bf16.mxu0 %vm1080_vm0, %v1079_v0  ;;  %937 = vmatpush3.bf16.msra.mxu0 %v565_v31 }
  0x9d   : > { %v480_v7 = vpop.permute.xlu0 %479 }
  0x9e   : > { %v485_v8 = vsel %vm424_vm1, %v480_v7, 0 }
  0x9f   : > { %931 = vmatpush3.bf16.xpose.msra.mxu1 %v485_v8 }
  0xa0   : > { %942 = vmatprep.subr.bf16.mxu1 %v1079_v0 }
  0xa1   : > { %v475_v9 = vpop.permute.xlu0 %474 }
  0xa6   : > { %933 = vmatmul.mubr.msk.bf16.vlgmr.msra.gmra.mrb[0].mxu1 %vm424_vm1, %v475_v9 }
  0xa7   : > { %944 = vmatprep.mubr.msk.bf16.mxu1 %vm1080_vm0, %v1079_v0  ;;  %943 = vmatpush3.bf16.msra.mxu1 %v565_v31 }
 0x104   : > { %v465_v11 = vpop.f32.mrb[0].mxu0 }
 0x105   : > { %v928_v12 = vpop.f32.mrb[1].mxu0  ;;  %v529_v20 = vsel %vm528_vm3, %v465_v11, -inf }
 0x106   : > { %v468_v13 = vpop.f32.mrb[2].mxu0 }
 0x107   : > { %v929_v14 = vpop.f32.mrb[3].mxu0 }
 0x179   : > { %v521_v15 = vpop.f32.mrb[0].mxu1 }
 0x17a   : > { %v934_v16 = vpop.f32.mrb[1].mxu1  ;;  %v611_v17 = vsel %vm528_vm3, %v521_v15, -inf }
 0x17b   : > { %612 = vmax.xlane.f32.xlu1 %v611_v17  ;;  %v524_v18 = vpop.f32.mrb[2].mxu1  ;;  %v912_v17 = vld [vmem:[%s1244_s4] ss:$0 sm:$0xff] (!%p911_p6) }
 0x17c   : > { %v935_v19 = vpop.f32.mrb[3].mxu1 }
 0x17f   : > { %530 = vmax.xlane.f32.xlu1 %v529_v20 }
 0x208   : > { %v613_v23 = vpop.xlane.xlu1 %612 }
 0x209   : > { %v614_v24 = vmax.f32 %v610_v22, %v613_v23 }
 0x20b   : > { %v615_v26 = vsub.f32 %v610_v22, %v614_v24  ;;  %686 = vst.msk [vmem:[#allocation4] sm:$0xff] %vm413_vm2, %v614_v24  ;;  %620 = vperm.xlu0 %1004, %v614_v24  }
 0x20c   : > { %v531_v27 = vpop.xlane.xlu1 %530 }
 0x20d   : > { %v532_v28 = vmax.f32 %v527_v25, %v531_v27  ;;  %v616_v46 = vmul.f32 1.442695, %v615_v26 }
 0x20f   : > { %v533_v29 = vsub.f32 %v527_v25, %v532_v28  ;;  %609 = vst.msk [vmem:[#allocation2] sm:$0xff] %vm413_vm2, %v532_v28  ;;  %538 = vperm.xlu1 %1005, %v532_v28  }
 0x211   : > { %v534_v44 = vmul.f32 1.442695, %v533_v29 }
 0x28a   : > { %v621_v32 = vpop.permute.xlu0 %620 }
 0x28b   : > { %v623_v33 = vsub.f32 %v521_v15, %v621_v32 }
 0x28d   : > { %v624_v34 = vmul.f32 1.442695, %v623_v33 }
 0x28e   : > { %v539_v35 = vpop.permute.xlu1 %538 }
 0x28f   : > { %1007 = vpow2.f32 %v624_v34  ;;  %v541_v36 = vsub.f32 %v465_v11, %v539_v35 }
 0x291   : > { %v542_v37 = vmul.f32 1.442695, %v541_v36 }
 0x293   : > { %1009 = vpow2.f32 %v542_v37 }
 0x294   : > { %1011 = vpow2.f32 %v534_v44 }
 0x295   : > { %1013 = vpow2.f32 %v616_v46 }
 0x299   : > { %v1008_v38 = vpop.eup %1007 }
 0x29a   : > { %v628_v39 = vsel %vm528_vm3, %v1008_v38, 0.0  ;;  %v640_v40 = vpack.c.bf16 %v1008_v38, %v1008_v38 }
 0x29b   : > { %629 = vadd.xlane.f32.xlu0 %v628_v39 }
 0x29c   : > { %945 = vmatmul.mubr.msk.bf16.vlgmr.msra.gmra.mrb[4].mxu1 %vm528_vm3, %v640_v40 }
 0x29d   : > { %v1010_v41 = vpop.eup %1009 }
 0x29e   : > { %v546_v42 = vsel %vm528_vm3, %v1010_v41, 0.0  ;;  %v559_v43 = vpack.c.bf16 %v1010_v41, %v1010_v41  ;;  %v1012_v45 = vpop.eup %1011 }
 0x29f   : > { %547 = vadd.xlane.f32.xlu1 %v546_v42  ;;  %v1014_v47 = vpop.eup %1013  ;;  %v545_v53 = vmul.f32 %v1012_v45, %v544_v51 }
 0x2a0   : > { %939 = vmatmul.mubr.msk.bf16.vlgmr.msra.gmra.mrb[4].mxu0 %vm528_vm3, %v559_v43  ;;  %v627_v49 = vmul.f32 %v1014_v47, %v626_v48 }
 0x2b1   : > { %555 = vperm.xlu0 %1004, %v1012_v45  }
 0x328   : > { %v630_v50 = vpop.xlane.xlu0 %629 }
 0x329   : > { %v631_v52 = vadd.f32 %v630_v50, %v627_v49 }
 0x32b   : > { %632 = vst.msk [vmem:[#allocation5] sm:$0xff] %vm413_vm2, %v631_v52 }
 0x32c   : > { %v548_v54 = vpop.xlane.xlu1 %547 }
 0x32d   : > { %v549_v55 = vadd.f32 %v548_v54, %v545_v53 }
 0x32f   : > { %551 = vst.msk [vmem:[#allocation3] sm:$0xff] %vm413_vm2, %v549_v55 }
 0x330   : > { %v556_v2 = vpop.permute.xlu0 %555 }
 0x331   : > { %v558_v9 = vmul.f32 0.0, %v556_v2 }
 0x332   : > { %v701_v56 = vld [vmem:[#allocation5] sm:$0xff] }
 0x333   : > { %704 = vperm.xlu1 %1005, %v701_v56  }
 0x336   : > { %v692_v57 = vld [vmem:[#allocation3] sm:$0xff] }
 0x337   : > { %695 = vperm.xlu0 %1004, %v692_v57  }
 0x33b   : > { %636 = vperm.xlu0 %1004, %v1014_v47  }
 0x36f   : > { %v678_v58 = vpop.f32.mrb[4].mxu1 }
 0x370   : > { %v946_v59 = vpop.f32.mrb[5].mxu1 }
 0x371   : > { %v681_v60 = vpop.f32.mrb[6].mxu1 }
 0x372   : > { %v947_v61 = vpop.f32.mrb[7].mxu1 }
 0x373   : > { %v601_v62 = vpop.f32.mrb[4].mxu0 }
 0x374   : > { %v940_v63 = vpop.f32.mrb[5].mxu0  ;;  %v607_v12 = vadd.f32 %v601_v62, %v558_v9 }
 0x375   : > { %v604_v0 = vpop.f32.mrb[6].mxu0 }
 0x376   : > { %v941_v1 = vpop.f32.mrb[7].mxu0 }
 0x3b2   : > { %v705_v3 = vpop.permute.xlu1 %704 }
 0x3b3   : > { %1015 = vrcp.f32 %v705_v3 }
 0x3b6   : > { %v696_v4 = vpop.permute.xlu0 %695 }
 0x3b7   : > { %1017 = vrcp.f32 %v696_v4 }
 0x3ba   : > { %v637_v5 = vpop.permute.xlu0 %636 }
 0x3bb   : > { %v639_v6 = vmul.f32 0.0, %v637_v5 }
 0x3bd   : > { %v1016_v7 = vpop.eup %1015  ;;  %v684_v8 = vadd.f32 %v678_v58, %v639_v6 }
 0x3be   : > { %715 = sbr.rel (%p911_p6) target bundleno = 969 (0x3c9), region = 56 }
 0x3bf   : > { %v708_v11 = vmul.f32 %v1016_v7, %v684_v8 }
 0x3c1   : > { %v1018_v13 = vpop.eup %1017  ;;  %v710_v14 = vmul.f32 %v709_v10, %v708_v11 }
 0x3c2   : > { %v699_v15 = vmul.f32 %v1018_v13, %v607_v12 }
 0x3c4   : > { %v711_v16 = vsub.f32 %v699_v15, %v710_v14 }
 0x3c6   : > { %v723_v18 = vadd.f32 %v912_v17, %v711_v16 }
 0x3c8   : > { %724 = vst [vmem:[%s1182_s14] sm:$0xff] %v723_v18 }
 0x3c9 PF: > { %p913_p7 = scmp.le.s32.totalorder %s1060_s18, 0 }
 0x3cb   : > { %728 = sbr.rel (%p913_p7) target bundleno = 979 (0x3d3), region = 60 }
 0x3cf   : > { %v729_v19 = vld [vmem:[%s1182_s14] sm:$0xff] (!%p913_p7) }
 0x3d0   : > { %v730_v20 = vadd.f32 (!%p913_p7), %v729_v19, %v711_v16 }
 0x3d2   : > { %731 = vst [vmem:[%s1182_s14] sm:$0xff] %v730_v20 }
 0x3d3 PF: > { %s16_s22 = sadd.s32 1, %s1076_s22   ;;  %s1248_s18 = smov %s1068_s20 }
 0x3d4   : > { %p13_p8 = scmp.ge.s32.totalorder %s16_s22, 6   ;;  %s1249_s19 = smov %s1072_s21 }
 0x3d5   : > { %s1250_s20 = smov %s1253_s24  ;;  %s1251_s21 = smov %s1257_s25 }
 0x3d6   :  { %15 = sbr.rel (!%p13_p8) target bundleno = 3 (0x3), region = 97 }
 0x3dd   :  { %757 = vsyncpa [#allocation9], 1 }
 0x3de   :  { %759 = vsyncpa [#allocation9 + $0x1], 1 }

// kernel: forward.26
= control target key start
LH: loop header
LB: loop body
LE: loop exit
PB: predicated region body
PF: predicated region fallthrough
CT: control target
= control target key end

     0   :  { %s107_s0 = inlined_call_operand.vmem [shape: f32[16,128], index: 0, kind: input, shape index: {}]   ;;  %s108_s1 = inlined_call_operand.vmem [shape: f32[1,128], index: 1, kind: input, shape index: {}]   ;;  %s109_s2 = inlined_call_operand.vmem [shape: f32[1,128], index: 2, kind: input, shape index: {}]   ;;  %s110_s3 = inlined_call_operand.vmem [shape: f32[16,128], index: 3, kind: output, shape index: {}]  }
   0x1   :  { %v14_v0 = vld [vmem:[%s107_s0] sm:$0xff]  ;;  %v15_v1 = vld [vmem:[%s107_s0 + $0x8] sm:$0xff] }
   0x2   :  { %18 = vadd.xlane.f32.xlu0 %v14_v0  ;;  %v63_v17 = vld [vmem:[%s108_s1] ss:$0 sm:$0xff] }
   0x3   :  { %v64_v19 = vld [vmem:[%s109_s2] ss:$0 sm:$0xff] }
   0x6   :  { %20 = vadd.xlane.f32.xlu0 %v15_v1 }
  0x8f   :  { %v19_v2 = vpop.xlane.xlu0 %18 }
  0x90   :  { %v23_v3 = vmul.f32 0.0078125, %v19_v2 }
  0x92   :  { %v25_v4 = vsub.f32 %v14_v0, %v23_v3 }
  0x93   :  { %v21_v5 = vpop.xlane.xlu0 %20 }
  0x94   :  { %v24_v6 = vmul.f32 0.0078125, %v21_v5  ;;  %v27_v7 = vmul.f32 %v25_v4, %v25_v4 }
  0x96   :  { %v26_v8 = vsub.f32 %v15_v1, %v24_v6  ;;  %29 = vadd.xlane.f32.xlu1 %v27_v7 }
  0x98   :  { %v28_v9 = vmul.f32 %v26_v8, %v26_v8 }
  0x9a   :  { %31 = vadd.xlane.f32.xlu1 %v28_v9 }
 0x123   :  { %v30_v10 = vpop.xlane.xlu1 %29 }
 0x124   :  { %v33_v11 = vmul.f32 0.0078125, %v30_v10 }
 0x126   :  { %v35_v12 = vadd.f32 1e-05, %v33_v11 }
 0x127   :  { %v32_v13 = vpop.xlane.xlu1 %31 }
 0x128   :  { %65 = vrsqrt.f32 %v35_v12  ;;  %v34_v14 = vmul.f32 0.0078125, %v32_v13 }
 0x12a   :  { %v36_v15 = vadd.f32 1e-05, %v34_v14 }
 0x12c   :  { %67 = vrsqrt.f32 %v36_v15 }
 0x132   :  { %v66_v16 = vpop.eup %65 }
 0x133   :  { %v39_v18 = vmul.f32 %v66_v16, %v25_v4 }
 0x135   :  { %v47_v20 = vmul.f32 %v63_v17, %v39_v18 }
 0x136   :  { %v68_v21 = vpop.eup %67 }
 0x137   :  { %v55_v22 = vadd.f32 %v64_v19, %v47_v20  ;;  %v40_v23 = vmul.f32 %v68_v21, %v26_v8 }
 0x139   :  { %57 = vst [vmem:[%s110_s3] sm:$0xff] %v55_v22  ;;  %v48_v24 = vmul.f32 %v63_v17, %v40_v23 }
 0x13b   :  { %v56_v25 = vadd.f32 %v64_v19, %v48_v24 }
 0x13d   :  { %58 = vst [vmem:[%s110_s3 + $0x8] sm:$0xff] %v56_v25 }

// kernel: forward.27
= control target key start
LH: loop header
LB: loop body
LE: loop exit
PB: predicated region body
PF: predicated region fallthrough
CT: control target
= control target key end

     0   :  { %v245_v1 = vmov 0.0   ;;  %vm246_vm0 = vmmov 0   ;;  %vm20_vm1 = vcmask 523264   ;;  %s321_s0 = inlined_call_operand.vmem [shape: f32[16,128], index: 0, kind: input, shape index: {}]   ;;  %s322_s1 = inlined_call_operand.vmem [shape: bf16[128,64], index: 1, kind: input, shape index: {}]   ;;  %s323_s2 = inlined_call_operand.vmem [shape: f32[1,64], index: 2, kind: input, shape index: {}]   ;;  %s324_s3 = inlined_call_operand.hbm [shape: f32[16,64], index: 3, kind: output, shape index: {}]  }
   0x1   :  { %v213_v0 = vld [vmem:[%s322_s1] sm:$0xff]   ;;  %188 = vmatprep.subr.bf16.mxu0 %v245_v1  ;;  %v214_v2 = vld [vmem:[%s322_s1 + $0x8] sm:$0xff]   ;;  %204 = vmatprep.mubr.msk.bf16.mxu0 %vm246_vm0, %v245_v1  ;;  %21 = vst.msk [vmem:[#allocation2] sm:$0xff] %vm20_vm1, %v245_v1  ;;  %22 = vst.msk [vmem:[#allocation2 + $0x8] sm:$0xff] %vm20_vm1, %v245_v1 }
   0x2   :  { %189 = vmatpush3.bf16.msra.mxu0 %v213_v0  ;;  %v215_v3 = vld [vmem:[%s322_s1 + $0x10] sm:$0xff]  }
   0x3   :  { %190 = vmatprep.subr.bf16.mxu0 %v245_v1 }
   0x6   :  { %191 = vmatpush3.bf16.msra.mxu0 %v214_v2 }
   0x7   :  { %192 = vmatprep.subr.bf16.mxu0 %v245_v1 }
   0x8   :  { %8 = vsyncpa [#allocation4], 0  ;;  %v216_v4 = vld [vmem:[%s322_s1 + $0x18] sm:$0xff]   ;;  %v217_v5 = vld [vmem:[%s322_s1 + $0x20] sm:$0xff]  }
   0x9   :  { %v218_v6 = vld [vmem:[%s322_s1 + $0x28] sm:$0xff]   ;;  %v219_v7 = vld [vmem:[%s322_s1 + $0x30] sm:$0xff]   ;;  %v220_v8 = vld [vmem:[%s322_s1 + $0x38] sm:$0xff]  }
   0xa   :  { %193 = vmatpush3.bf16.msra.mxu0 %v215_v3  ;;  %v25_v9 = vld [vmem:[%s321_s0] sm:$0xff]  ;;  %v26_v10 = vld [vmem:[%s321_s0 + $0x8] sm:$0xff]  ;;  %s247_s0 = smov [#allocation3]  }
   0xb   :  { %194 = vmatprep.subr.bf16.mxu0 %v245_v1  ;;  %v27_v11 = vpack.c.bf16 %v26_v10, %v25_v9  ;;  %v23_v12 = vld [vmem:[#allocation2] sm:$0xff]  ;;  %v24_v14 = vld [vmem:[#allocation2 + $0x8] sm:$0xff]  ;;  %s159_s6 = sshll.u32 %s247_s0, 4  ;;  %s160_s6 = int_to_ptr.vmem [resolvable:$true] %s159_s6 }
   0xc   :  { %v178_v20 = vld [vmem:[%s323_s2] ss:$0 sm:$0xff]  ;;  %s221_s7 = scalar_lea.vmem %s160_s6, 256  ;;  %p226_p1 = scmp.lt.s32.totalorder %s160_s6, %s160_s6 }
   0xd   :  { %p222_p0 = scmp.ne.s32.totalorder %s160_s6, %s221_s7  ;;  %p227_p2 = scmp.lt.s32.totalorder %s221_s7, %s221_s7 }
   0xe   :  { %195 = vmatpush3.bf16.msra.mxu0 %v216_v4 }
   0xf   :  { %196 = vmatprep.subr.bf16.mxu0 %v245_v1  ;;  %p228_p3 = por %p227_p2, %p226_p1 }
  0x11   :  { %p229_p4 = pnand %p228_p3, %p222_p0 }
  0x12   :  { %197 = vmatpush3.bf16.msra.mxu0 %v217_v5 }
  0x13   :  { %198 = vmatprep.subr.bf16.mxu0 %v245_v1 }
  0x16   :  { %199 = vmatpush3.bf16.msra.mxu0 %v218_v6 }
  0x17   :  { %200 = vmatprep.subr.bf16.mxu0 %v245_v1 }
  0x1a   :  { %201 = vmatpush3.bf16.msra.mxu0 %v219_v7 }
  0x1b   :  { %202 = vmatprep.subr.bf16.mxu0 %v245_v1 }
  0x1e   :  { %203 = vmatpush3.bf16.msra.mxu0 %v220_v8 }
  0x21   :  { %205 = vmatmul.mubr.bf16.vlgmr.msra.gmra.mrb[0].mxu0 %v27_v11 }
  0xf4   :  { %v126_v13 = vpop.f32.mrb[0].mxu0 }
  0xf5   :  { %v133_v15 = vadd.f32 %v126_v13, %v23_v12  ;;  %v206_v16 = vpop.f32.mrb[1].mxu0 }
  0xf6   :  { %v129_v17 = vpop.f32.mrb[2].mxu0 }
  0xf7   :  { %136 = vst.msk [vmem:[#allocation2] sm:$0xff] %vm20_vm1, %v133_v15  ;;  %v134_v18 = vadd.f32 %v129_v17, %v24_v14  ;;  %v207_v19 = vpop.f32.mrb[3].mxu0 }
  0xf9   :  { %137 = vst.msk [vmem:[#allocation2 + $0x8] sm:$0xff] %vm20_vm1, %v134_v18 }
  0xfe   :  { %v141_v21 = vld [vmem:[#allocation2] sm:$0xff] }
  0xff   :  { %v150_v22 = vadd.f32 %v178_v20, %v141_v21 }
 0x100   :  { %v142_v23 = vld [vmem:[#allocation2 + $0x8] sm:$0xff] }
 0x101   :  { %v151_v24 = vadd.f32 %v178_v20, %v142_v23  ;;  %152 = vst.msk [vmem:[#allocation3] sm:$0xff] %vm20_vm1, %v150_v22 }
 0x103   :  { %153 = vst.msk [vmem:[#allocation3 + $0x8] sm:$0xff] %vm20_vm1, %v151_v24 }
 0x104   :  { %232 = shalt.err (!%p229_p4)
}
 0x105   :  { %s233_s9 = scalar_lea.hbm %s324_s3, 256 }
 0x106   :  { %p234_p5 = scmp.ne.s32.totalorder %s324_s3, %s233_s9  ;;  %p237_p6 = scmp.lt.u32.totalorder %s233_s9, %s324_s3 }
 0x108   :  { %p239_p7 = pnand %p237_p6, %p234_p5 }
 0x10a   :  { %242 = shalt.err (!%p239_p7)
}
 0x10b   :  { %s248_s14 = smov 128   ;;  %s249_s15 = smov 8  }
 0x10c   :  { %165 = dma.vmem_to_hbm [thread:$0]  %s160_s6, 256, %s324_s3, [#allocation4], %s248_s14, %s248_s14, %s249_s15  }
 0x10d   :  { %243 = dma.done.wait [#allocation4], 256  }
 0x10e   :  { %244 = vsyncadd [#allocation4], 4294967040 }
 0x10f   :  { %169 = vsyncpa [#allocation4], 1 }

// kernel: forward.18
= control target key start
LH: loop header
LB: loop body
LE: loop exit
PB: predicated region body
PF: predicated region fallthrough
CT: control target
= control target key end

     0   :  { %v976_v1 = vmov 0   ;;  %s1259_s1 = inlined_call_operand.vmem [shape: bf16[128,512], index: 1, kind: input, shape index: {}]   ;;  %s1260_s0 = inlined_call_operand.vmem [shape: f32[16,128], index: 0, kind: input, shape index: {}]   ;;  %s1261_s3 = inlined_call_operand.vmem [shape: bf16[512,128], index: 3, kind: input, shape index: {}]   ;;  %s1262_s2 = inlined_call_operand.vmem [shape: f32[1,512], index: 2, kind: input, shape index: {}]   ;;  %s1263_s4 = inlined_call_operand.vmem [shape: f32[1,128], index: 4, kind: input, shape index: {}]   ;;  %s1264_s5 = inlined_call_operand.vmem [shape: f32[16,128], index: 5, kind: output, shape index: {}]  }
   0x1   :  { %v880_v0 = vld [vmem:[%s1259_s1 + $0x4] ss:$16 sps:$4 sm:$0xff]   ;;  %276 = vmatprep.mubr.bf16.mxu0 %v976_v1  ;;  %319 = vmatprep.mubr.bf16.mxu1 %v976_v1  ;;  %v882_v2 = vld [vmem:[%s1259_s1 + $0xc] ss:$16 sps:$4 sm:$0xff]   ;;  %v884_v3 = vld [vmem:[%s1259_s1] ss:$16 sps:$4 sm:$0xff]  }
   0x2   :  { %244 = vmatprep.subr.bf16.mxu0 %v880_v0  ;;  %v885_v4 = vld [vmem:[%s1259_s1 + $0x8] ss:$16 sps:$4 sm:$0xff]   ;;  %287 = vmatprep.subr.bf16.mxu1 %v882_v2  ;;  %v886_v5 = vld [vmem:[%s1259_s1 + $0x24] ss:$16 sps:$4 sm:$0xff]   ;;  %v888_v6 = vld [vmem:[%s1259_s1 + $0x2c] ss:$16 sps:$4 sm:$0xff]  }
   0x3   :  { %245 = vmatpush1.bf16.msra.mxu0 %v884_v3  ;;  %288 = vmatpush1.bf16.msra.mxu1 %v885_v4  ;;  %v890_v7 = vld [vmem:[%s1259_s1 + $0x20] ss:$16 sps:$4 sm:$0xff]   ;;  %v891_v8 = vld [vmem:[%s1259_s1 + $0x28] ss:$16 sps:$4 sm:$0xff]   ;;  %v892_v9 = vld [vmem:[%s1259_s1 + $0x44] ss:$16 sps:$4 sm:$0xff]   ;;  %v64_v4 = vlaneseq }
   0x4   :  { %246 = vmatprep.subr.bf16.mxu0 %v886_v5  ;;  %289 = vmatprep.subr.bf16.mxu1 %v888_v6  ;;  %v894_v10 = vld [vmem:[%s1259_s1 + $0x4c] ss:$16 sps:$4 sm:$0xff]   ;;  %v896_v11 = vld [vmem:[%s1259_s1 + $0x40] ss:$16 sps:$4 sm:$0xff]   ;;  %v897_v12 = vld [vmem:[%s1259_s1 + $0x48] ss:$16 sps:$4 sm:$0xff]  }
   0x5   :  { %v898_v13 = vld [vmem:[%s1259_s1 + $0x64] ss:$16 sps:$4 sm:$0xff]   ;;  %v900_v14 = vld [vmem:[%s1259_s1 + $0x6c] ss:$16 sps:$4 sm:$0xff]   ;;  %v902_v15 = vld [vmem:[%s1259_s1 + $0x60] ss:$16 sps:$4 sm:$0xff]  }
   0x6   :  { %v903_v16 = vld [vmem:[%s1259_s1 + $0x68] ss:$16 sps:$4 sm:$0xff]   ;;  %v904_v17 = vld [vmem:[%s1259_s1 + $0x84] ss:$16 sps:$4 sm:$0xff]   ;;  %v906_v18 = vld [vmem:[%s1259_s1 + $0x8c] ss:$16 sps:$4 sm:$0xff]  }
   0x7   :  { %247 = vmatpush1.bf16.msra.mxu0 %v890_v7  ;;  %290 = vmatpush1.bf16.msra.mxu1 %v891_v8  ;;  %v908_v19 = vld [vmem:[%s1259_s1 + $0x80] ss:$16 sps:$4 sm:$0xff]   ;;  %v909_v20 = vld [vmem:[%s1259_s1 + $0x88] ss:$16 sps:$4 sm:$0xff]   ;;  %v910_v21 = vld [vmem:[%s1259_s1 + $0xa4] ss:$16 sps:$4 sm:$0xff]  }
   0x8   :  { %248 = vmatprep.subr.bf16.mxu0 %v892_v9  ;;  %291 = vmatprep.subr.bf16.mxu1 %v894_v10  ;;  %v912_v22 = vld [vmem:[%s1259_s1 + $0xac] ss:$16 sps:$4 sm:$0xff]   ;;  %v914_v23 = vld [vmem:[%s1259_s1 + $0xa0] ss:$16 sps:$4 sm:$0xff]   ;;  %v915_v24 = vld [vmem:[%s1259_s1 + $0xa8] ss:$16 sps:$4 sm:$0xff]  }
   0x9   :  { %v916_v25 = vld [vmem:[%s1259_s1 + $0xc4] ss:$16 sps:$4 sm:$0xff]   ;;  %v918_v26 = vld [vmem:[%s1259_s1 + $0xcc] ss:$16 sps:$4 sm:$0xff]   ;;  %v920_v27 = vld [vmem:[%s1259_s1 + $0xc0] ss:$16 sps:$4 sm:$0xff]  }
   0xa   :  { %v921_v28 = vld [vmem:[%s1259_s1 + $0xc8] ss:$16 sps:$4 sm:$0xff]   ;;  %v922_v29 = vld [vmem:[%s1259_s1 + $0xe4] ss:$16 sps:$4 sm:$0xff]   ;;  %v924_v30 = vld [vmem:[%s1259_s1 + $0xec] ss:$16 sps:$4 sm:$0xff]  }
   0xb   :  { %249 = vmatpush1.bf16.msra.mxu0 %v896_v11  ;;  %292 = vmatpush1.bf16.msra.mxu1 %v897_v12  ;;  %v926_v31 = vld [vmem:[%s1259_s1 + $0xe0] ss:$16 sps:$4 sm:$0xff]   ;;  %v927_v32 = vld [vmem:[%s1259_s1 + $0xe8] ss:$16 sps:$4 sm:$0xff]   ;;  %v65_v5 = vshrl.u32 %v64_v4, 7 }
   0xc   :  { %250 = vmatprep.subr.bf16.mxu0 %v898_v13  ;;  %293 = vmatprep.subr.bf16.mxu1 %v900_v14  ;;  %v27_v33 = vld [vmem:[%s1260_s0] sm:$0xff]  ;;  %v28_v34 = vld [vmem:[%s1260_s0 + $0x8] sm:$0xff]  ;;  %v936_v44 = vld [vmem:[%s1261_s3 + $0x50] sm:$0xff]  }
   0xd   :  { %v29_v35 = vpack.c.bf16 %v28_v34, %v27_v33  ;;  %v928_v36 = vld [vmem:[%s1261_s3 + $0x40] sm:$0xff]   ;;  %v932_v40 = vld [vmem:[%s1261_s3 + $0x48] sm:$0xff]   ;;  %v937_v45 = vld [vmem:[%s1261_s3 + $0xd0] sm:$0xff]   ;;  %v66_v6 = vsub.s32 0, %v65_v5  ;;  %v74_v7 = vsub.s32 2, %v65_v5  ;;  %v70_v9 = vsub.s32 1, %v65_v5 }
   0xe   :  { %v929_v37 = vld [vmem:[%s1261_s3 + $0xc0] sm:$0xff]   ;;  %v933_v41 = vld [vmem:[%s1261_s3 + $0xc8] sm:$0xff]   ;;  %v938_v46 = vld [vmem:[%s1261_s3 + $0x10] sm:$0xff]   ;;  %v78_v10 = vsub.s32 3, %v65_v5 }
   0xf   :  { %251 = vmatpush1.bf16.msra.mxu0 %v902_v15  ;;  %294 = vmatpush1.bf16.msra.mxu1 %v903_v16  ;;  %v930_v38 = vld [vmem:[%s1261_s3] sm:$0xff]   ;;  %v934_v42 = vld [vmem:[%s1261_s3 + $0x8] sm:$0xff]   ;;  %v939_v47 = vld [vmem:[%s1261_s3 + $0x90] sm:$0xff]  }
  0x10   :  { %252 = vmatprep.subr.bf16.mxu0 %v904_v17  ;;  %295 = vmatprep.subr.bf16.mxu1 %v906_v18  ;;  %v931_v39 = vld [vmem:[%s1261_s3 + $0x80] sm:$0xff]   ;;  %v935_v43 = vld [vmem:[%s1261_s3 + $0x88] sm:$0xff]   ;;  %v940_v48 = vld [vmem:[%s1261_s3 + $0x58] sm:$0xff]  }
  0x11   :  { %v941_v49 = vld [vmem:[%s1261_s3 + $0xd8] sm:$0xff]   ;;  %v944_v52 = vld [vmem:[%s1261_s3 + $0x60] sm:$0xff]   ;;  %v948_v56 = vld [vmem:[%s1261_s3 + $0x68] sm:$0xff]  }
  0x12   :  { %v942_v50 = vld [vmem:[%s1261_s3 + $0x18] sm:$0xff]   ;;  %v945_v53 = vld [vmem:[%s1261_s3 + $0xe0] sm:$0xff]   ;;  %v949_v57 = vld [vmem:[%s1261_s3 + $0xe8] sm:$0xff]  }
  0x13   :  { %253 = vmatpush1.bf16.msra.mxu0 %v908_v19  ;;  %296 = vmatpush1.bf16.msra.mxu1 %v909_v20  ;;  %v943_v51 = vld [vmem:[%s1261_s3 + $0x98] sm:$0xff]   ;;  %v946_v54 = vld [vmem:[%s1261_s3 + $0x20] sm:$0xff]   ;;  %v950_v58 = vld [vmem:[%s1261_s3 + $0x28] sm:$0xff]  }
  0x14   :  { %254 = vmatprep.subr.bf16.mxu0 %v910_v21  ;;  %297 = vmatprep.subr.bf16.mxu1 %v912_v22  ;;  %v947_v55 = vld [vmem:[%s1261_s3 + $0xa0] sm:$0xff]   ;;  %v951_v59 = vld [vmem:[%s1261_s3 + $0xa8] sm:$0xff]   ;;  %v952_v60 = vld [vmem:[%s1261_s3 + $0x70] sm:$0xff]  }
  0x15   :  { %v953_v61 = vld [vmem:[%s1261_s3 + $0xf0] sm:$0xff]   ;;  %v956_v0 = vld [vmem:[%s1261_s3 + $0x78] sm:$0xff]   ;;  %v62_v8 = vld [vmem:[%s1262_s2] sm:$0xf] }
  0x16   :  { %v954_v62 = vld [vmem:[%s1261_s3 + $0x30] sm:$0xff]   ;;  %v957_v1 = vld [vmem:[%s1261_s3 + $0xf8] sm:$0xff]   ;;  %v67_v11 = vrot.slane %v62_v8, %v66_v6  ;;  %v75_v12 = vrot.slane %v62_v8, %v74_v7  ;;  %v71_v13 = vrot.slane %v62_v8, %v70_v9  ;;  %v79_v14 = vrot.slane %v62_v8, %v78_v10 }
  0x17   :  { %255 = vmatpush1.bf16.msra.mxu0 %v914_v23  ;;  %298 = vmatpush1.bf16.msra.mxu1 %v915_v24  ;;  %v955_v63 = vld [vmem:[%s1261_s3 + $0xb0] sm:$0xff]   ;;  %v958_v2 = vld [vmem:[%s1261_s3 + $0x38] sm:$0xff]  }
  0x18   :  { %256 = vmatprep.subr.bf16.mxu0 %v916_v25  ;;  %299 = vmatprep.subr.bf16.mxu1 %v918_v26  ;;  %v959_v3 = vld [vmem:[%s1261_s3 + $0xb8] sm:$0xff]  }
  0x1b   :  { %257 = vmatpush1.bf16.msra.mxu0 %v920_v27  ;;  %300 = vmatpush1.bf16.msra.mxu1 %v921_v28 }
  0x1c   :  { %258 = vmatprep.subr.bf16.mxu0 %v922_v29  ;;  %301 = vmatprep.subr.bf16.mxu1 %v924_v30 }
  0x1f   :  { %259 = vmatpush1.bf16.msra.mxu0 %v926_v31  ;;  %302 = vmatpush1.bf16.msra.mxu1 %v927_v32 }
  0x20   :  { %835 = vmatprep.subr.bf16.mxu0 %v928_v36  ;;  %857 = vmatprep.subr.bf16.mxu1 %v929_v37 }
  0x22   :  { %277 = vmatmul.mubr.bf16.vlgmr.msra.gmra.mrb[0].mxu0 %v29_v35  ;;  %320 = vmatmul.mubr.bf16.vlgmr.msra.gmra.mrb[0].mxu1 %v29_v35 }
  0x23   :  { %836 = vmatpush3.bf16.msra.mxu0 %v930_v38  ;;  %858 = vmatpush3.bf16.msra.mxu1 %v931_v39 }
  0x24   :  { %837 = vmatprep.subr.bf16.mxu0 %v932_v40  ;;  %859 = vmatprep.subr.bf16.mxu1 %v933_v41 }
  0x27   :  { %838 = vmatpush3.bf16.msra.mxu0 %v934_v42  ;;  %860 = vmatpush3.bf16.msra.mxu1 %v935_v43 }
  0x28   :  { %839 = vmatprep.subr.bf16.mxu0 %v936_v44  ;;  %861 = vmatprep.subr.bf16.mxu1 %v937_v45 }
  0x2b   :  { %840 = vmatpush3.bf16.msra.mxu0 %v938_v46  ;;  %862 = vmatpush3.bf16.msra.mxu1 %v939_v47 }
  0x2c   :  { %841 = vmatprep.subr.bf16.mxu0 %v940_v48  ;;  %863 = vmatprep.subr.bf16.mxu1 %v941_v49 }
  0x2f   :  { %842 = vmatpush3.bf16.msra.mxu0 %v942_v50  ;;  %864 = vmatpush3.bf16.msra.mxu1 %v943_v51 }
  0x30   :  { %843 = vmatprep.subr.bf16.mxu0 %v944_v52  ;;  %865 = vmatprep.subr.bf16.mxu1 %v945_v53 }
  0x33   :  { %844 = vmatpush3.bf16.msra.mxu0 %v946_v54  ;;  %866 = vmatpush3.bf16.msra.mxu1 %v947_v55 }
  0x34   :  { %845 = vmatprep.subr.bf16.mxu0 %v948_v56  ;;  %867 = vmatprep.subr.bf16.mxu1 %v949_v57 }
  0x37   :  { %846 = vmatpush3.bf16.msra.mxu0 %v950_v58  ;;  %868 = vmatpush3.bf16.msra.mxu1 %v951_v59 }
  0x38   :  { %847 = vmatprep.subr.bf16.mxu0 %v952_v60  ;;  %869 = vmatprep.subr.bf16.mxu1 %v953_v61 }
  0x3b   :  { %848 = vmatpush3.bf16.msra.mxu0 %v954_v62  ;;  %870 = vmatpush3.bf16.msra.mxu1 %v955_v63 }
  0x3c   :  { %849 = vmatprep.subr.bf16.mxu0 %v956_v0  ;;  %871 = vmatprep.subr.bf16.mxu1 %v957_v1 }
  0x3f   :  { %850 = vmatpush3.bf16.msra.mxu0 %v958_v2  ;;  %872 = vmatpush3.bf16.msra.mxu1 %v959_v3 }
  0xf5   :  { %v278_v15 = vpop.f32.mrb[0].mxu0  ;;  %v321_v16 = vpop.f32.mrb[0].mxu1 }
  0xf6   :  { %v1208_v17 = vadd.f32 %v278_v15, %v67_v11  ;;  %v1210_v18 = vadd.f32 %v321_v16, %v75_v12  ;;  %v280_v19 = vpop.f32.mrb[1].mxu0  ;;  %v323_v20 = vpop.f32.mrb[1].mxu1 }
  0xf7   :  { %v1212_v21 = vadd.f32 %v280_v19, %v71_v13  ;;  %v1214_v22 = vadd.f32 %v323_v20, %v79_v14  ;;  %v282_v23 = vpop.f32.mrb[2].mxu0  ;;  %v325_v24 = vpop.f32.mrb[2].mxu1 }
  0xf8   :  { %v338_v25 = vmul.f32 0.044715, %v1208_v17  ;;  %v340_v26 = vmul.f32 0.044715, %v1210_v18  ;;  %v283_v27 = vadd.f32 %v282_v23, %v67_v11  ;;  %v326_v28 = vadd.f32 %v325_v24, %v75_v12  ;;  %v284_v29 = vpop.f32.mrb[3].mxu0  ;;  %v327_v30 = vpop.f32.mrb[3].mxu1 }
  0xf9   :  { %v339_v31 = vmul.f32 0.044715, %v1212_v21  ;;  %v341_v32 = vmul.f32 0.044715, %v1214_v22  ;;  %v1220_v33 = vadd.f32 %v284_v29, %v71_v13  ;;  %v1222_v34 = vadd.f32 %v327_v30, %v79_v14 }
  0xfa   :  { %v346_v35 = vmul.f32 %v338_v25, %v1208_v17  ;;  %v348_v36 = vmul.f32 %v340_v26, %v1210_v18  ;;  %v342_v37 = vmul.f32 0.044715, %v283_v27  ;;  %v344_v38 = vmul.f32 0.044715, %v326_v28 }
  0xfb   :  { %v347_v39 = vmul.f32 %v339_v31, %v1212_v21  ;;  %v349_v40 = vmul.f32 %v341_v32, %v1214_v22  ;;  %v343_v41 = vmul.f32 0.044715, %v1220_v33  ;;  %v345_v42 = vmul.f32 0.044715, %v1222_v34 }
  0xfc   :  { %v354_v43 = vmul.f32 %v346_v35, %v1208_v17  ;;  %v356_v44 = vmul.f32 %v348_v36, %v1210_v18  ;;  %v350_v45 = vmul.f32 %v342_v37, %v283_v27  ;;  %v352_v46 = vmul.f32 %v344_v38, %v326_v28 }
  0xfd   :  { %v355_v47 = vmul.f32 %v347_v39, %v1212_v21  ;;  %v357_v48 = vmul.f32 %v349_v40, %v1214_v22  ;;  %v351_v49 = vmul.f32 %v343_v41, %v1220_v33  ;;  %v353_v50 = vmul.f32 %v345_v42, %v1222_v34 }
  0xfe   :  { %v362_v51 = vadd.f32 %v354_v43, %v1208_v17  ;;  %v364_v52 = vadd.f32 %v356_v44, %v1210_v18  ;;  %v358_v53 = vmul.f32 %v350_v45, %v283_v27  ;;  %v360_v54 = vmul.f32 %v352_v46, %v326_v28 }
  0xff   :  { %v359_v55 = vmul.f32 %v351_v49, %v1220_v33  ;;  %v361_v56 = vmul.f32 %v353_v50, %v1222_v34  ;;  %v363_v61 = vadd.f32 %v355_v47, %v1212_v21  ;;  %v365_v1 = vadd.f32 %v357_v48, %v1214_v22 }
 0x100   :  { %v370_v57 = vmul.f32 0.7978846, %v362_v51  ;;  %v372_v58 = vmul.f32 0.7978846, %v364_v52  ;;  %v366_v59 = vadd.f32 %v358_v53, %v283_v27  ;;  %v368_v60 = vadd.f32 %v360_v54, %v326_v28  ;;  %v834_v53 = vld [vmem:[%s1263_s4] ss:$0 sm:$0xff] }
 0x101   :  { %v367_v62 = vadd.f32 %v359_v55, %v1220_v33  ;;  %v371_v2 = vmul.f32 0.7978846, %v363_v61  ;;  %v369_v4 = vadd.f32 %v361_v56, %v1222_v34  ;;  %v373_v5 = vmul.f32 0.7978846, %v365_v1 }
 0x102   :  { %960 = vtanh.f32 %v370_v57  ;;  %v374_v63 = vmul.f32 0.7978846, %v366_v59  ;;  %v376_v0 = vmul.f32 0.7978846, %v368_v60  ;;  %v330_v13 = vmul.f32 0.5, %v1208_v17 }
 0x103   :  { %962 = vtanh.f32 %v372_v58  ;;  %v375_v3 = vmul.f32 0.7978846, %v367_v62  ;;  %v377_v6 = vmul.f32 0.7978846, %v369_v4  ;;  %v334_v14 = vmul.f32 0.5, %v283_v27 }
 0x104   :  { %964 = vtanh.f32 %v374_v63  ;;  %v332_v19 = vmul.f32 0.5, %v1210_v18  ;;  %v336_v20 = vmul.f32 0.5, %v326_v28  ;;  %v331_v25 = vmul.f32 0.5, %v1212_v21 }
 0x105   :  { %966 = vtanh.f32 %v376_v0  ;;  %v335_v32 = vmul.f32 0.5, %v1220_v33  ;;  %v333_v27 = vmul.f32 0.5, %v1214_v22  ;;  %v337_v38 = vmul.f32 0.5, %v1222_v34 }
 0x106   :  { %968 = vtanh.f32 %v371_v2 }
 0x107   :  { %970 = vtanh.f32 %v375_v3 }
 0x108   :  { %972 = vtanh.f32 %v373_v5 }
 0x109   :  { %974 = vtanh.f32 %v377_v6 }
 0x10c   :  { %v961_v7 = vpop.eup %960 }
 0x10d   :  { %v963_v8 = vpop.eup %962  ;;  %v386_v9 = vadd.f32 1.0, %v961_v7 }
 0x10e   :  { %v965_v10 = vpop.eup %964  ;;  %v388_v11 = vadd.f32 1.0, %v963_v8 }
 0x10f   :  { %v967_v12 = vpop.eup %966  ;;  %v390_v15 = vadd.f32 1.0, %v965_v10  ;;  %v394_v29 = vmul.f32 %v386_v9, %v330_v13 }
 0x110   :  { %v969_v16 = vpop.eup %968  ;;  %v392_v23 = vadd.f32 1.0, %v967_v12  ;;  %v396_v36 = vmul.f32 %v388_v11, %v332_v19 }
 0x111   :  { %v971_v24 = vpop.eup %970  ;;  %v387_v26 = vadd.f32 1.0, %v969_v16  ;;  %v398_v30 = vmul.f32 %v390_v15, %v334_v14 }
 0x112   :  { %v973_v31 = vpop.eup %972  ;;  %v391_v35 = vadd.f32 1.0, %v971_v24  ;;  %v400_v37 = vmul.f32 %v392_v23, %v336_v20 }
 0x113   :  { %v975_v17 = vpop.eup %974  ;;  %v389_v18 = vadd.f32 1.0, %v973_v31  ;;  %v404_v28 = vpack.c.bf16 %v398_v30, %v394_v29  ;;  %v395_v39 = vmul.f32 %v387_v26, %v331_v25 }
 0x114   :  { %v399_v40 = vmul.f32 %v391_v35, %v335_v32  ;;  %v393_v41 = vadd.f32 1.0, %v975_v17  ;;  %v406_v21 = vpack.c.bf16 %v400_v37, %v396_v36 }
 0x115   :  { %v397_v43 = vmul.f32 %v389_v18, %v333_v27 }
 0x116   :  { %v405_v42 = vpack.c.bf16 %v399_v40, %v395_v39  ;;  %v401_v44 = vmul.f32 %v393_v41, %v337_v38 }
 0x118   :  { %696 = vmatprep.mubr.bf16.mxu0 %v405_v42  ;;  %v407_v45 = vpack.c.bf16 %v401_v44, %v397_v43 }
 0x119   :  { %697 = vmatmul.mubr.bf16.vlgmr.msra.gmra.mrb[4].mxu0 %v404_v28 }
 0x11a   :  { %737 = vmatprep.mubr.bf16.mxu1 %v407_v45 }
 0x11b   :  { %738 = vmatmul.mubr.bf16.vlgmr.msra.gmra.mrb[4].mxu1 %v406_v21 }
 0x1ec   :  { %v851_v33 = vpop.f32.mrb[4].mxu0 }
 0x1ed   :  { %v852_v46 = vpop.f32.mrb[5].mxu0 }
 0x1ee   :  { %v873_v47 = vpop.f32.mrb[4].mxu1  ;;  %v853_v22 = vadd.f32 %v852_v46, %v851_v33  ;;  %v854_v48 = vpop.f32.mrb[6].mxu0 }
 0x1ef   :  { %v874_v34 = vpop.f32.mrb[5].mxu1  ;;  %v855_v49 = vpop.f32.mrb[7].mxu0 }
 0x1f0   :  { %v875_v50 = vadd.f32 %v874_v34, %v873_v47  ;;  %v876_v51 = vpop.f32.mrb[6].mxu1  ;;  %v856_v52 = vadd.f32 %v855_v49, %v854_v48 }
 0x1f1   :  { %v877_v54 = vpop.f32.mrb[7].mxu1 }
 0x1f2   :  { %v740_v55 = vadd.f32 %v875_v50, %v853_v22  ;;  %v878_v56 = vadd.f32 %v877_v54, %v876_v51 }
 0x1f4   :  { %v762_v57 = vadd.f32 %v834_v53, %v740_v55  ;;  %v743_v58 = vadd.f32 %v878_v56, %v856_v52 }
 0x1f6   :  { %764 = vst [vmem:[%s1264_s5] sm:$0xff] %v762_v57  ;;  %v763_v59 = vadd.f32 %v834_v53, %v743_v58 }
 0x1f8   :  { %765 = vst [vmem:[%s1264_s5 + $0x8] sm:$0xff] %v763_v59 }

</bundles_post_ra>
